<compile_context>
chip_gen: v6e
topology: v6e:2x2x1
jax: 0.10.0
libtpu: 0.0.40
codegen_flags: <defaults>
</compile_context>

<pallas_src>
import math

import jax
import jax.numpy as jnp
from jax.experimental import pallas as pl
from jax.experimental.pallas import tpu as pltpu


def up_kernel(x_ref, c_ref,
              w1x_ref, w1c_ref, b1_ref,
              w2z_ref, w2c_ref, b2_ref,
              out_ref):
    D = out_ref.shape[-1]
    # In-kernel bf16 cast (cheaper than a wrapper cast pass: one f32 HBM read
    # instead of read-f32 + write-bf16 + read-bf16).
    x = x_ref[...].astype(jnp.bfloat16)            # (tb, in_dim)
    c = c_ref[...].astype(jnp.bfloat16)            # (tb, const_dim)

    # ---- wedge_in: SwiGLU(cat([x, const])) ----
    # concat folded into two row-split matmuls summed in f32; a|g fused -> N=2D.
    h1 = (jnp.dot(x, w1x_ref[...], preferred_element_type=jnp.float32)
          + jnp.dot(c, w1c_ref[...], preferred_element_type=jnp.float32)
          + b1_ref[...])                            # (tb, 2D) f32
    z = h1[:, :D] * jax.nn.silu(h1[:, D:])          # free lane-aligned split

    # ---- wedge_out: SwiGLU(cat([silu(z), const])) ----
    sz = jax.nn.silu(z).astype(jnp.bfloat16)
    h2 = (jnp.dot(sz, w2z_ref[...], preferred_element_type=jnp.float32)
          + jnp.dot(c, w2c_ref[...], preferred_element_type=jnp.float32)
          + b2_ref[...])                            # (tb, 2D) f32
    z2 = h2[:, :D] * jax.nn.silu(h2[:, D:])

    out_ref[...] = (z + z2).astype(out_ref.dtype)   # f32, lane-dense store


def init_params(key, in_dim, out_dim, const_dim):
    """Canonical f32 params (weights already transposed: y = x @ W + b)."""
    k1, k2, k3, k4 = jax.random.split(key, 4)
    in1 = in_dim + const_dim
    in2 = out_dim + const_dim
    s1 = 1.0 / math.sqrt(in1)
    s2 = 1.0 / math.sqrt(in2)
    w1 = jax.random.uniform(k1, (in1, 2 * out_dim), jnp.float32, -s1, s1)
    b1 = jax.random.uniform(k2, (1, 2 * out_dim), jnp.float32, -s1, s1)
    w2 = jax.random.uniform(k3, (in2, 2 * out_dim), jnp.float32, -s2, s2)
    b2 = jax.random.uniform(k4, (1, 2 * out_dim), jnp.float32, -s2, s2)
    return (w1, b1, w2, b2)


def prepare_params(params, in_dim):
    """Row-split W1 into x/const blocks and W2 into z/const blocks (a|g halves
    stay fused along N = 2*D), cast matmul operands to bf16, biases stay f32."""
    w1, b1, w2, b2 = params
    D = w1.shape[1] // 2
    w1x, w1c = w1[:in_dim, :], w1[in_dim:, :]   # rows: x part / const part
    w2z, w2c = w2[:D, :], w2[D:, :]             # rows: silu(z) part / const part
    bf = lambda a: a.astype(jnp.bfloat16)
    return (bf(w1x), bf(w1c), b1, bf(w2z), bf(w2c), b2)


def _pick_tile(B, tile_b):
    """Clamp the batch tile: multiple of 16 (bf16 sublane packing), >= 8."""
    tile_b = min(tile_b, B)
    if tile_b >= 16:
        return (tile_b // 16) * 16
    if tile_b >= 8:
        return 8
    return B  # tiny batch: single full block (block dim == full array dim)


def up_forward(x, const, prepared, *, tile_b=128):
    (w1x, w1c, b1, w2z, w2c, b2) = prepared
    B, in_dim = x.shape
    const_dim = const.shape[1]
    D = w1x.shape[1] // 2
    assert D % 128 == 0, "out_dim must be a multiple of 128 (lane-dense stores)"

    tile_b = _pick_tile(B, tile_b)
    grid = (pl.cdiv(B, tile_b),)                 # partial final block, no pad copy

    act = lambda i: (i, 0)                       # batch-tiled activations
    res = lambda i: (0, 0)                       # grid-invariant resident weights

    flops = 2 * B * 2 * D * ((in_dim + const_dim) + (D + const_dim))
    transcendentals = 3 * B * D
    bytes_accessed = ((x.size + const.size) * 4 + B * D * 4
                      + sum(w.size * 2 for w in (w1x, w1c, w2z, w2c))
                      + (b1.size + b2.size) * 4)

    return pl.pallas_call(
        up_kernel,
        out_shape=jax.ShapeDtypeStruct((B, D), jnp.float32),
        grid_spec=pltpu.PrefetchScalarGridSpec(
            num_scalar_prefetch=0,
            grid=grid,
            in_specs=[
                pl.BlockSpec((tile_b, in_dim), act),       # x
                pl.BlockSpec((tile_b, const_dim), act),    # const
                pl.BlockSpec((in_dim, 2 * D), res),        # W1 x-rows   [a|g]
                pl.BlockSpec((const_dim, 2 * D), res),     # W1 const-rows
                pl.BlockSpec((1, 2 * D), res),             # b1 fused
                pl.BlockSpec((D, 2 * D), res),             # W2 z-rows   [a|g]
                pl.BlockSpec((const_dim, 2 * D), res),     # W2 const-rows
                pl.BlockSpec((1, 2 * D), res),             # b2 fused
            ],
            out_specs=pl.BlockSpec((tile_b, D), act),
        ),
        compiler_params=pltpu.CompilerParams(
            dimension_semantics=("parallel",)),
        cost_estimate=pl.CostEstimate(
            flops=flops, transcendentals=transcendentals,
            bytes_accessed=bytes_accessed),
    )(x, const, w1x, w1c, b1, w2z, w2c, b2)


def up_reference_bf16(x, const, prepared):
    """Plain-JAX reference mirroring the kernel's exact mixed-precision path."""
    (w1x, w1c, b1, w2z, w2c, b2) = prepared
    D = w1x.shape[1] // 2
    xb = x.astype(jnp.bfloat16)
    cb = const.astype(jnp.bfloat16)
    h1 = (jnp.dot(xb, w1x, preferred_element_type=jnp.float32)
          + jnp.dot(cb, w1c, preferred_element_type=jnp.float32) + b1)
    z = h1[:, :D] * jax.nn.silu(h1[:, D:])
    sz = jax.nn.silu(z).astype(jnp.bfloat16)
    h2 = (jnp.dot(sz, w2z, preferred_element_type=jnp.float32)
          + jnp.dot(cb, w2c, preferred_element_type=jnp.float32) + b2)
    return z + h2[:, :D] * jax.nn.silu(h2[:, D:])


def up_reference_f32(x, const, params):
    """Full-precision reference mirroring the PyTorch module."""
    w1, b1, w2, b2 = params
    D = w1.shape[1] // 2

    def swiglu(inp, w, b):
        h = inp @ w + b
        return h[:, :D] * jax.nn.silu(h[:, D:])

    z = swiglu(jnp.concatenate([x, const], -1), w1, b1)
    z2 = swiglu(jnp.concatenate([jax.nn.silu(z), const], -1), w2, b2)
    return z + z2


if __name__ == "__main__":
    B, in_dim, out_dim, const_dim = 512, 128, 128, 128

    key = jax.random.PRNGKey(0)
    kx, kc, kp = jax.random.split(key, 3)
    x = jax.random.normal(kx, (B, in_dim), jnp.float32)
    const = jax.random.normal(kc, (B, const_dim), jnp.float32)
    params = init_params(kp, in_dim, out_dim, const_dim)
    prepared = prepare_params(params, in_dim)

    out = up_forward(x, const, prepared, tile_b=128)
    out = jax.block_until_ready(out)

    assert out.shape == (B, out_dim)
    # Tight check vs. a reference that uses the identical bf16/f32 mixed path.
    ref_bf = up_reference_bf16(x, const, prepared)
    assert jnp.allclose(out, ref_bf, atol=5e-3, rtol=5e-3), "mismatch vs bf16 reference"
    # Loose check vs. the exact f32 module semantics (bf16 quantization error only).
    ref_f32 = up_reference_f32(x, const, params)
    assert jnp.allclose(out, ref_f32, atol=1e-1, rtol=1e-1), "mismatch vs f32 reference"

    print("KERNEL_OK")
</pallas_src>

<mosaic_0001>
module attributes {stable_mosaic.version = 11 : i64} {
  func.func @up_kernel(%arg0: i32, %arg1: memref<128x128xf32, #tpu.memory_space<vmem>>, %arg2: memref<128x128xf32, #tpu.memory_space<vmem>>, %arg3: memref<128x256xbf16, #tpu.memory_space<vmem>>, %arg4: memref<128x256xbf16, #tpu.memory_space<vmem>>, %arg5: memref<1x256xf32, #tpu.memory_space<vmem>>, %arg6: memref<128x256xbf16, #tpu.memory_space<vmem>>, %arg7: memref<128x256xbf16, #tpu.memory_space<vmem>>, %arg8: memref<1x256xf32, #tpu.memory_space<vmem>>, %arg9: memref<128x128xf32, #tpu.memory_space<vmem>>) attributes {dimension_semantics = [#tpu.dimension_semantics<parallel>], iteration_bounds = array<i64: 4>, scalar_prefetch = 0 : i64, scratch_operands = 0 : i64, tpu.core_type = #tpu.core_type<tc>, window_params = [{transform_indices = @transform_0, window_bounds = array<i64: 128, 128>}, {transform_indices = @transform_1, window_bounds = array<i64: 128, 128>}, {pipeline_mode = #tpu.pipeline_mode<synchronous>, transform_indices = @transform_2, window_bounds = array<i64: 128, 256>}, {pipeline_mode = #tpu.pipeline_mode<synchronous>, transform_indices = @transform_3, window_bounds = array<i64: 128, 256>}, {pipeline_mode = #tpu.pipeline_mode<synchronous>, transform_indices = @transform_4, window_bounds = array<i64: 1, 256>}, {pipeline_mode = #tpu.pipeline_mode<synchronous>, transform_indices = @transform_5, window_bounds = array<i64: 128, 256>}, {pipeline_mode = #tpu.pipeline_mode<synchronous>, transform_indices = @transform_6, window_bounds = array<i64: 128, 256>}, {pipeline_mode = #tpu.pipeline_mode<synchronous>, transform_indices = @transform_7, window_bounds = array<i64: 1, 256>}, {transform_indices = @transform_8, window_bounds = array<i64: 128, 128>}]} {
    %c0 = arith.constant 0 : index
    %c0_0 = arith.constant 0 : index
    %0 = vector.load %arg1[%c0, %c0_0] : memref<128x128xf32, #tpu.memory_space<vmem>>, vector<128x128xf32>
    %1 = arith.truncf %0 : vector<128x128xf32> to vector<128x128xbf16>
    %c0_1 = arith.constant 0 : index
    %c0_2 = arith.constant 0 : index
    %2 = vector.load %arg2[%c0_1, %c0_2] : memref<128x128xf32, #tpu.memory_space<vmem>>, vector<128x128xf32>
    %3 = arith.truncf %2 : vector<128x128xf32> to vector<128x128xbf16>
    %c0_3 = arith.constant 0 : index
    %c0_4 = arith.constant 0 : index
    %4 = vector.load %arg3[%c0_3, %c0_4] : memref<128x256xbf16, #tpu.memory_space<vmem>>, vector<128x256xbf16>
    %cst = arith.constant dense<0.000000e+00> : vector<128x256xf32>
    %5 = tpu.matmul %1, %4, %cst {dimension_numbers = #tpu.dot_dimension_numbers<[1], [0], [0], [1], [0, 0, 1, 1], [], []>} : vector<128x128xbf16>, vector<128x256xbf16>, vector<128x256xf32> -> vector<128x256xf32>
    %c0_5 = arith.constant 0 : index
    %c0_6 = arith.constant 0 : index
    %6 = vector.load %arg4[%c0_5, %c0_6] : memref<128x256xbf16, #tpu.memory_space<vmem>>, vector<128x256xbf16>
    %cst_7 = arith.constant dense<0.000000e+00> : vector<128x256xf32>
    %7 = tpu.matmul %3, %6, %cst_7 {dimension_numbers = #tpu.dot_dimension_numbers<[1], [0], [0], [1], [0, 0, 1, 1], [], []>} : vector<128x128xbf16>, vector<128x256xbf16>, vector<128x256xf32> -> vector<128x256xf32>
    %8 = arith.addf %5, %7 : vector<128x256xf32>
    %c0_8 = arith.constant 0 : index
    %c0_9 = arith.constant 0 : index
    %9 = vector.load %arg5[%c0_8, %c0_9] : memref<1x256xf32, #tpu.memory_space<vmem>>, vector<1x256xf32>
    %10 = vector.broadcast %9 : vector<1x256xf32> to vector<128x256xf32>
    %11 = arith.addf %8, %10 : vector<128x256xf32>
    %12 = vector.extract_strided_slice %11 {offsets = [0, 0], sizes = [128, 128], strides = [1, 1]} : vector<128x256xf32> to vector<128x128xf32>
    %13 = vector.extract_strided_slice %11 {offsets = [0, 128], sizes = [128, 128], strides = [1, 1]} : vector<128x256xf32> to vector<128x128xf32>
    %14 = arith.negf %13 : vector<128x128xf32>
    %15 = math.exp %14 : vector<128x128xf32>
    %cst_10 = arith.constant 1.000000e+00 : f32
    %16 = vector.broadcast %cst_10 : f32 to vector<128x128xf32>
    %17 = arith.addf %16, %15 : vector<128x128xf32>
    %18 = arith.divf %16, %17 : vector<128x128xf32>
    %19 = arith.mulf %13, %18 : vector<128x128xf32>
    %20 = arith.mulf %12, %19 : vector<128x128xf32>
    %21 = arith.negf %20 : vector<128x128xf32>
    %22 = math.exp %21 : vector<128x128xf32>
    %cst_11 = arith.constant 1.000000e+00 : f32
    %23 = vector.broadcast %cst_11 : f32 to vector<128x128xf32>
    %24 = arith.addf %23, %22 : vector<128x128xf32>
    %25 = arith.divf %23, %24 : vector<128x128xf32>
    %26 = arith.mulf %20, %25 : vector<128x128xf32>
    %27 = arith.truncf %26 : vector<128x128xf32> to vector<128x128xbf16>
    %c0_12 = arith.constant 0 : index
    %c0_13 = arith.constant 0 : index
    %28 = vector.load %arg6[%c0_12, %c0_13] : memref<128x256xbf16, #tpu.memory_space<vmem>>, vector<128x256xbf16>
    %cst_14 = arith.constant dense<0.000000e+00> : vector<128x256xf32>
    %29 = tpu.matmul %27, %28, %cst_14 {dimension_numbers = #tpu.dot_dimension_numbers<[1], [0], [0], [1], [0, 0, 1, 1], [], []>} : vector<128x128xbf16>, vector<128x256xbf16>, vector<128x256xf32> -> vector<128x256xf32>
    %c0_15 = arith.constant 0 : index
    %c0_16 = arith.constant 0 : index
    %30 = vector.load %arg7[%c0_15, %c0_16] : memref<128x256xbf16, #tpu.memory_space<vmem>>, vector<128x256xbf16>
    %cst_17 = arith.constant dense<0.000000e+00> : vector<128x256xf32>
    %31 = tpu.matmul %3, %30, %cst_17 {dimension_numbers = #tpu.dot_dimension_numbers<[1], [0], [0], [1], [0, 0, 1, 1], [], []>} : vector<128x128xbf16>, vector<128x256xbf16>, vector<128x256xf32> -> vector<128x256xf32>
    %32 = arith.addf %29, %31 : vector<128x256xf32>
    %c0_18 = arith.constant 0 : index
    %c0_19 = arith.constant 0 : index
    %33 = vector.load %arg8[%c0_18, %c0_19] : memref<1x256xf32, #tpu.memory_space<vmem>>, vector<1x256xf32>
    %34 = vector.broadcast %33 : vector<1x256xf32> to vector<128x256xf32>
    %35 = arith.addf %32, %34 : vector<128x256xf32>
    %36 = vector.extract_strided_slice %35 {offsets = [0, 0], sizes = [128, 128], strides = [1, 1]} : vector<128x256xf32> to vector<128x128xf32>
    %37 = vector.extract_strided_slice %35 {offsets = [0, 128], sizes = [128, 128], strides = [1, 1]} : vector<128x256xf32> to vector<128x128xf32>
    %38 = arith.negf %37 : vector<128x128xf32>
    %39 = math.exp %38 : vector<128x128xf32>
    %cst_20 = arith.constant 1.000000e+00 : f32
    %40 = vector.broadcast %cst_20 : f32 to vector<128x128xf32>
    %41 = arith.addf %40, %39 : vector<128x128xf32>
    %42 = arith.divf %40, %41 : vector<128x128xf32>
    %43 = arith.mulf %37, %42 : vector<128x128xf32>
    %44 = arith.mulf %36, %43 : vector<128x128xf32>
    %45 = arith.addf %20, %44 : vector<128x128xf32>
    %c0_21 = arith.constant 0 : index
    %c0_22 = arith.constant 0 : index
    %46 = vector.load %arg9[%c0_21, %c0_22] : memref<128x128xf32, #tpu.memory_space<vmem>>, vector<128x128xf32>
    tpu.vector_store %arg9[%c0_21, %c0_22], %45 {strides = array<i32>} : memref<128x128xf32, #tpu.memory_space<vmem>>, vector<128x128xf32>,
    return
  }
  func.func @transform_0(%arg0: i32) -> (i32, i32) {
    %c0_i32 = arith.constant 0 : i32
    %c0_i32_0 = arith.constant 0 : i32
    return %arg0, %c0_i32 : i32, i32
  }
  func.func @transform_1(%arg0: i32) -> (i32, i32) {
    %c0_i32 = arith.constant 0 : i32
    %c0_i32_0 = arith.constant 0 : i32
    return %arg0, %c0_i32 : i32, i32
  }
  func.func @transform_2(%arg0: i32) -> (i32, i32) {
    %c0_i32 = arith.constant 0 : i32
    %c0_i32_0 = arith.constant 0 : i32
    %c0_i32_1 = arith.constant 0 : i32
    return %c0_i32, %c0_i32_0 : i32, i32
  }
  func.func @transform_3(%arg0: i32) -> (i32, i32) {
    %c0_i32 = arith.constant 0 : i32
    %c0_i32_0 = arith.constant 0 : i32
    %c0_i32_1 = arith.constant 0 : i32
    return %c0_i32, %c0_i32_0 : i32, i32
  }
  func.func @transform_4(%arg0: i32) -> (i32, i32) {
    %c0_i32 = arith.constant 0 : i32
    %c0_i32_0 = arith.constant 0 : i32
    %c0_i32_1 = arith.constant 0 : i32
    return %c0_i32, %c0_i32_0 : i32, i32
  }
  func.func @transform_5(%arg0: i32) -> (i32, i32) {
    %c0_i32 = arith.constant 0 : i32
    %c0_i32_0 = arith.constant 0 : i32
    %c0_i32_1 = arith.constant 0 : i32
    return %c0_i32, %c0_i32_0 : i32, i32
  }
  func.func @transform_6(%arg0: i32) -> (i32, i32) {
    %c0_i32 = arith.constant 0 : i32
    %c0_i32_0 = arith.constant 0 : i32
    %c0_i32_1 = arith.constant 0 : i32
    return %c0_i32, %c0_i32_0 : i32, i32
  }
  func.func @transform_7(%arg0: i32) -> (i32, i32) {
    %c0_i32 = arith.constant 0 : i32
    %c0_i32_0 = arith.constant 0 : i32
    %c0_i32_1 = arith.constant 0 : i32
    return %c0_i32, %c0_i32_0 : i32, i32
  }
  func.func @transform_8(%arg0: i32) -> (i32, i32) {
    %c0_i32 = arith.constant 0 : i32
    %c0_i32_0 = arith.constant 0 : i32
    return %arg0, %c0_i32 : i32, i32
  }
}

</mosaic_0001>

<bundles_post_ra>
// kernel: tpu_custom_call.1
= control target key start
LH: loop header
LB: loop body
LE: loop exit
PB: predicated region body
PF: predicated region fallthrough
CT: control target
= control target key end

     0   :  { %s3673_s0 = inlined_call_operand.hbm [shape: f32[512,128], index: 0, kind: input, shape index: {}]   ;;  %s3674_s1 = inlined_call_operand.hbm [shape: f32[512,128], index: 1, kind: input, shape index: {}]   ;;  %s3675_s2 = inlined_call_operand.hbm [shape: bf16[128,256], index: 2, kind: input, shape index: {}]   ;;  %s3676_s3 = inlined_call_operand.hbm [shape: bf16[128,256], index: 3, kind: input, shape index: {}]   ;;  %s3677_s4 = inlined_call_operand.vmem [shape: f32[1,256], index: 4, kind: input, shape index: {}]   ;;  %s3678_s5 = inlined_call_operand.hbm [shape: bf16[128,256], index: 5, kind: input, shape index: {}]   ;;  %s3679_s6 = inlined_call_operand.hbm [shape: bf16[128,256], index: 6, kind: input, shape index: {}]   ;;  %s3680_s7 = inlined_call_operand.vmem [shape: f32[1,256], index: 7, kind: input, shape index: {}]   ;;  %s3681_s8 = inlined_call_operand.hbm [shape: f32[512,128], index: 8, kind: output, shape index: {}]  }
   0x1   :  { %3690 = sst [smem:[#allocation21_spill]] %s3673_s0 }
   0x2   :  { %3691 = sst [smem:[#allocation22_spill]] %s3675_s2 }
   0x3   :  { %3692 = sst [smem:[#allocation23_spill]] %s3676_s3 }
   0x4   :  { %3693 = sst [smem:[#allocation24_spill]] %s3678_s5 }
   0x5   :  { %3694 = sst [smem:[#allocation25_spill]] %s3679_s6 }
   0x6   :  { %13 = vsyncpa [#allocation3], 0 }
   0x7   :  { %15 = vsyncpa [#allocation3 + $0x1], 0 }
   0x8   :  { %16 = vsyncpa [#allocation6], 0 }
   0x9   :  { %18 = vsyncpa [#allocation6 + $0x1], 0 }
   0xa   :  { %19 = vsyncpa [#allocation9], 0 }
   0xb   :  { %20 = vsyncpa [#allocation12], 0 }
   0xc   :  { %21 = vsyncpa [#allocation4], 0 }
   0xd   :  { %23 = vsyncpa [#allocation4 + $0x1], 0  ;;  %s2779_s27 = smov 0   ;;  %s2781_s28 = smov 0  }
   0xe   :  { %s2783_s29 = smov 0   ;;  %s2785_s30 = smov 0  }
   0xf LB: > { %s2800_s9 = sadd.s32 4294967295, %s2720_s30   ;;  %s1954_s10 = sadd.s32 4294967294, %s2720_s30   ;;  %s2720_s30 = sphi %s2785_s30, %s3722_s30   ;;  %s2716_s29 = sphi %s2783_s29, %s3721_s29   ;;  %s2712_s28 = sphi %s2781_s28, %s3720_s28   ;;  %s2708_s27 = sphi %s2779_s27, %s3719_s27  }
  0x10   : > { %p49_p0 = scmp.ne.s32.totalorder %s2712_s28, %s2708_s27  ;;  %p3682_p1 = scmp.eq.s32.totalorder %s2800_s9, 0 }
  0x11   : > { %p225_p2 = scmp.eq.s32.totalorder %s2800_s9, 3  ;;  %p231_p3 = scmp.eq.s32.totalorder %s1954_s10, 3 }
  0x12   : > { %p2809_p4 = por %p3682_p1, %p49_p0  ;;  %p1955_p5 = scmp.ge.s32.totalorder %s2720_s30, 1 }
  0x13   : > { %p2814_p6 = por %p231_p3, %p49_p0  ;;  %p238_p7 = scmp.lt.s32.totalorder %s2720_s30, 5 }
  0x14   : > { %s3695_s11 = scalar_select %p2809_p4, 1, 0 }
  0x15   : > { %s3696_s12 = scalar_select %p2814_p6, 1, 0 }
  0x16   : > { %p2819_p8 = pnand %p1955_p5, %p238_p7  ;;  %s2722_s14 = smov [#allocation7]  }
  0x17   : > { %s250_s15 = sshll.u32 %s2722_s14, 4  ;;  %s2723_s17 = smov [#allocation8]   ;;  %s251_s15 = int_to_ptr.vmem [resolvable:$true] %s250_s15 }
  0x18   : > { %p2117_p9 = pneg %p2819_p8  ;;  %s263_s18 = sshll.u32 %s2723_s17, 4  ;;  %s264_s18 = int_to_ptr.vmem [resolvable:$true] %s263_s18 }
  0x19   : > { %s2724_s19 = smov [#allocation10]   ;;  %s2491_s21 = scalar_lea.vmem %s251_s15, 2048 }
  0x1a   : > { %p2827_p10 = pnand %p2117_p9, %p3682_p1  ;;  %s279_s20 = sshll.u32 %s2724_s19, 4  ;;  %s280_s20 = int_to_ptr.vmem [resolvable:$true] %s279_s20 }
  0x1b   : > { %p2492_p12 = scmp.ne.s32.totalorder %s251_s15, %s2491_s21  ;;  %p2499_p3 = scmp.lt.s32.totalorder %s251_s15, %s251_s15 }
  0x1c   : > { %p2482_p11 = pneg %p2827_p10  ;;  %p2500_p5 = scmp.lt.s32.totalorder %s2491_s21, %s2491_s21 }
  0x1e   : > { %p2494_p13 = pnand %p2492_p12, %p2482_p11  ;;  %p2501_p7 = por %p2500_p5, %p2499_p3 }
  0x20   : > { %p2495_p0 = pneg %p2494_p13 }
  0x22   : > { %p2502_p9 = pnand %p2501_p7, %p2495_p0 }
  0x24   : > { %2505 = shalt.err (!%p2502_p9)
}
  0x25   : > { %s3683_s22 = smov 128   ;;  %s3685_s23 = smov 8  }
  0x26   : > { %s3699_s2 = sld [smem:[#allocation22_spill]]  ;;  %s2517_s26 = scalar_lea.vmem %s264_s18, 2048 }
  0x27   : > { %p2518_p12 = scmp.ne.s32.totalorder %s264_s18, %s2517_s26  ;;  %p2525_p0 = scmp.lt.s32.totalorder %s264_s18, %s264_s18 }
  0x28   : > { %p2526_p5 = scmp.lt.s32.totalorder %s2517_s26, %s2517_s26 }
  0x29   : > { %p2520_p13 = pnand %p2518_p12, %p2482_p11 }
  0x2a   : > { %p2527_p7 = por %p2526_p5, %p2525_p0 }
  0x2b   : > { %p2521_p3 = pneg %p2520_p13 }
  0x2c   : > { %2120 = dma.hbm_to_vmem [thread:$0]  (!%p2827_p10), %s3699_s2, 2048, %s251_s15, [#allocation6], %s3683_s22, %s3683_s22, %s3685_s23  }
  0x2d   : > { %p2528_p9 = pnand %p2527_p7, %p2521_p3 }
  0x2f   : > { %2531 = shalt.err (!%p2528_p9)
}
  0x30   : > { %s3700_s3 = sld [smem:[#allocation23_spill]]  ;;  %s2543_s15 = scalar_lea.vmem %s280_s20, 2048 }
  0x31   : > { %p2544_p1 = scmp.ne.s32.totalorder %s280_s20, %s2543_s15  ;;  %p2551_p0 = scmp.lt.s32.totalorder %s280_s20, %s280_s20 }
  0x32   : > { %p2552_p3 = scmp.lt.s32.totalorder %s2543_s15, %s2543_s15 }
  0x33   : > { %p2546_p12 = pnand %p2544_p1, %p2482_p11 }
  0x34   : > { %p2553_p5 = por %p2552_p3, %p2551_p0 }
  0x35   : > { %p2547_p13 = pneg %p2546_p12 }
  0x36   : > { %2123 = dma.hbm_to_vmem [thread:$0]  (!%p2827_p10), %s3700_s3, 2048, %s264_s18, [#allocation9], %s3683_s22, %s3683_s22, %s3685_s23  }
  0x37   : > { %p2554_p7 = pnand %p2553_p5, %p2547_p13 }
  0x39   : > { %2557 = shalt.err (!%p2554_p7)
}
  0x3a   : > { %s3701_s5 = sld [smem:[#allocation24_spill]]  ;;  %s2727_s18 = smov [#allocation11]  }
  0x3b   : > { %s292_s21 = sshll.u32 %s2727_s18, 4  ;;  %s293_s21 = int_to_ptr.vmem [resolvable:$true] %s292_s21 }
  0x3c   : > { %s2569_s24 = scalar_lea.vmem %s293_s21, 2048  ;;  %p2577_p13 = scmp.lt.s32.totalorder %s293_s21, %s293_s21 }
  0x3d   : > { %p2570_p1 = scmp.ne.s32.totalorder %s293_s21, %s2569_s24  ;;  %p2578_p0 = scmp.lt.s32.totalorder %s2569_s24, %s2569_s24 }
  0x3f   : > { %p2572_p9 = pnand %p2570_p1, %p2482_p11  ;;  %p2579_p3 = por %p2578_p0, %p2577_p13 }
  0x40   : > { %2126 = dma.hbm_to_vmem [thread:$0]  (!%p2827_p10), %s3701_s5, 2048, %s280_s20, [#allocation9], %s3683_s22, %s3683_s22, %s3685_s23  }
  0x41   : > { %p2573_p12 = pneg %p2572_p9 }
  0x43   : > { %p2580_p5 = pnand %p2579_p3, %p2573_p12 }
  0x45   : > { %2583 = shalt.err (!%p2580_p5)
}
  0x46   : > { %s3702_s6 = sld [smem:[#allocation25_spill]]  ;;  %s2878_s26 = sadd.s32 1, %s2720_s30  }
  0x47   : > { %s36_s16 = sadd.s32 1, %s2716_s29  ;;  %s33_s10 = ssub.s32 %s2720_s30, %s2878_s26 }
  0x48   : > { %p43_p11 = scmp.ne.s32.totalorder %s2716_s29, %s2712_s28  ;;  %p34_p7 = scmp.eq.s32.totalorder %s33_s10, 0 }
  0x49   : > { %p44_p1 = scmp.eq.s32.totalorder %s2720_s30, 0  ;;  %p2145_p12 = scmp.lt.s32.totalorder %s2720_s30, 4 }
  0x4a   : > { %p2888_p9 = por %p225_p2, %p43_p11  ;;  %s309_s17 = sand.u32 1, %s2716_s29  }
  0x4b   : > { %s2894_s15 = scalar_select %p34_p7, %s2716_s29, %s36_s16  }
  0x4c   : > { %2129 = dma.hbm_to_vmem [thread:$0]  (!%p2827_p10), %s3702_s6, 2048, %s293_s21, [#allocation12], %s3683_s22, %s3683_s22, %s3685_s23  }
  0x4d   : > { %s3703_s14 = scalar_select %p2888_p9, 1, 0 }
  0x4e   : > { %p45_p13 = por %p44_p1, %p43_p11  ;;  %s1961_s19 = sshll.u32 %s309_s17, 7 }
  0x4f   : > { %s2092_s18 = sshll.u32 %s2720_s30, 11  ;;  %s3704_s0 = sld [smem:[#allocation21_spill]] }
  0x50   : > { %s313_s25 = scalar_lea.vmem [#allocation2], %s1961_s19  ;;  %p2905_p2 = pnand %p2145_p12, %p45_p13 }
  0x51   : > { %s320_s10 = sshll.u32 %s313_s25, 4  ;;  %s2912_s2 = scalar_lea.hbm %s3674_s1, %s2092_s18  ;;  %s2903_s10 = int_to_ptr.vmem [resolvable:$true] %s320_s10 }
  0x52   : > { %s334_s21 = scalar_lea.vmem [#allocation5], %s1961_s19  ;;  %s2916_s3 = scalar_lea.sflag [#allocation3], %s309_s17 }
  0x53   : > { %s2914_s24 = sshll.u32 %s334_s21, 4  ;;  %p2586_p0 = pneg %p2905_p2  ;;  %s2947_s24 = int_to_ptr.vmem [resolvable:$true] %s2914_s24 }
  0x55   : > { %s2901_s20 = scalar_lea.hbm %s3704_s0, %s2092_s18  ;;  %s2589_s23 = scalar_lea.hbm %s3704_s0, 8192 }
  0x56   : > { %s2584_s5 = scalar_lea.hbm %s2901_s20, 2048  ;;  %p2590_p11 = scmp.lt.s32.totalorder %s2901_s20, %s3704_s0 }
  0x57   : > { %p2585_p10 = scmp.ne.s32.totalorder %s2901_s20, %s2584_s5  ;;  %p2591_p7 = scmp.lt.s32.totalorder %s2589_s23, %s2584_s5 }
  0x59   : > { %p2587_p3 = pnand %p2586_p0, %p2585_p10  ;;  %p2592_p1 = por %p2591_p7, %p2590_p11 }
  0x5b   : > { %p2588_p5 = pneg %p2587_p3 }
  0x5d   : > { %p2593_p12 = pnand %p2592_p1, %p2588_p5 }
  0x5f   : > { %2596 = shalt.err (!%p2593_p12)
}
  0x60   : > { %s2597_s17 = scalar_lea.vmem %s2903_s10, 2048  ;;  %s2728_s6 = smov [#allocation2]  }
  0x61   : > { %p2598_p13 = scmp.ne.s32.totalorder %s2903_s10, %s2597_s17  ;;  %s2602_s19 = sshll.u32 %s2728_s6, 4  ;;  %s2603_s19 = int_to_ptr.vmem [resolvable:$false] %s2602_s19 }
  0x62   : > { %s2604_s21 = scalar_lea.vmem %s2603_s19, 4096  ;;  %p2605_p6 = scmp.lt.s32.totalorder %s2903_s10, %s2603_s19 }
  0x63   : > { %p2600_p10 = pnand %p2598_p13, %p2586_p0  ;;  %p2606_p9 = scmp.lt.s32.totalorder %s2604_s21, %s2597_s17 }
  0x65   : > { %p2601_p3 = pneg %p2600_p10  ;;  %p2607_p4 = por %p2606_p9, %p2605_p6 }
  0x67   : > { %p2608_p11 = pnand %p2607_p4, %p2601_p3 }
  0x69   : > { %2611 = shalt.err (!%p2608_p11)
}
  0x6a   : > { %s3706_s5 = smov 8   ;;  %s3707_s25 = smov 128  }
  0x6b   : > { %2133 = dma.hbm_to_vmem [thread:$0]  (!%p2905_p2), %s2901_s20, 2048, %s2903_s10, %s2916_s3, %s3707_s25, %s3707_s25, %s3706_s5  }
  0x6c   : > { %s330_s23 = sand.u32 1, %s2720_s30   ;;  %s2612_s18 = scalar_lea.hbm %s2912_s2, 2048 }
  0x6d   : > { %s331_s16 = scalar_lea.sflag [#allocation6], %s330_s23  ;;  %p2613_p4 = scmp.ne.s32.totalorder %s2912_s2, %s2612_s18 }
  0x6e   : > { %s2617_s19 = scalar_lea.hbm %s3674_s1, 8192  ;;  %p2618_p5 = scmp.lt.s32.totalorder %s2912_s2, %s3674_s1 }
  0x6f   : > { %p2615_p6 = pnand %p2613_p4, %p2586_p0  ;;  %p2619_p7 = scmp.lt.s32.totalorder %s2617_s19, %s2612_s18 }
  0x71   : > { %p2616_p9 = pneg %p2615_p6  ;;  %p2620_p1 = por %p2619_p7, %p2618_p5 }
  0x73   : > { %p2621_p12 = pnand %p2620_p1, %p2616_p9 }
  0x75   : > { %2624 = shalt.err (!%p2621_p12)
}
  0x76   : > { %s2625_s3 = scalar_lea.vmem %s2947_s24, 2048  ;;  %s2729_s20 = smov [#allocation5]  }
  0x77   : > { %p2626_p13 = scmp.ne.s32.totalorder %s2947_s24, %s2625_s3  ;;  %s2630_s10 = sshll.u32 %s2729_s20, 4  ;;  %s2631_s10 = int_to_ptr.vmem [resolvable:$false] %s2630_s10 }
  0x78   : > { %s2632_s23 = scalar_lea.vmem %s2631_s10, 4096  ;;  %p2633_p11 = scmp.lt.s32.totalorder %s2947_s24, %s2631_s10 }
  0x79   : > { %p2628_p10 = pnand %p2626_p13, %p2586_p0  ;;  %p2634_p4 = scmp.lt.s32.totalorder %s2632_s23, %s2625_s3 }
  0x7b   : > { %p2629_p3 = pneg %p2628_p10  ;;  %p2635_p6 = por %p2634_p4, %p2633_p11 }
  0x7d   : > { %p2636_p5 = pnand %p2635_p6, %p2629_p3 }
  0x7f   : > { %2639 = shalt.err (!%p2636_p5)
}
  0x80   : > { %2136 = dma.hbm_to_vmem [thread:$0]  (!%p2905_p2), %s2912_s2, 2048, %s2947_s24, %s331_s16, %s3707_s25, %s3707_s25, %s3706_s5  }
  0x81   : > { %353 = sbr.rel (%p2819_p8) target bundleno = 775 (0x307), region = 52 }
  0x86   : > { %s2978_s0 = sand.u32 1, %s2712_s28   ;;  %p3708_p0 = scmp.ne.s32.totalorder %s3695_s11, 0 }
  0x87   : > { %s2981_s18 = sshll.u32 %s2978_s0, 7  ;;  %s356_s17 = scalar_lea.sflag [#allocation3], %s2978_s0 }
  0x88   : > { %s2985_s22 = scalar_lea.vmem [#allocation2], %s2981_s18 }
  0x89   : > { %2683 = dma.done.wait (%p3708_p0), %s356_s17, 2048  }
  0x8a   : > { %2685 = vsyncadd (%p3708_p0), %s356_s17, 4294965248  ;;  %s364_s2 = sand.u32 1, %s2800_s9   ;;  %s2993_s24 = scalar_lea.vmem [#allocation5], %s2981_s18 }
  0x8b   : > { %s365_s13 = scalar_lea.sflag [#allocation6], %s364_s2 }
  0x8c   : > { %2687 = dma.done.wait (%p3708_p0), %s365_s13, 2048  }
  0x8d   : > { %2689 = vsyncadd (%p3708_p0), %s365_s13, 4294965248  ;;  %p3709_p8 = scmp.eq.s32.totalorder %s2800_s9, 0 }
  0x8f   : > { %2691 = dma.done.wait (%p3709_p8), [#allocation6], 2048   ;;  %p3710_p2 = pmov %p3709_p8 }
  0x91   : > { %2693 = vsyncadd (%p3710_p2), [#allocation6], 4294965248  ;;  %p3711_p9 = pmov %p3710_p2 }
  0x92   : > { %p3712_p7 = pmov %p3710_p2 }
  0x93   : > { %2695 = dma.done.wait (%p3711_p9), [#allocation9], 4096  }
  0x94   : > { %2697 = vsyncadd (%p3712_p7), [#allocation9], 4294963200  ;;  %p3713_p1 = pmov %p3710_p2 }
  0x96   : > { %2699 = dma.done.wait (%p3713_p1), [#allocation12], 2048   ;;  %p3714_p12 = pmov %p3713_p1 }
  0x97   : > { %v2730_v0 = vmov 0   ;;  %v2192_v1 = vld [vmem:[#allocation8 + $0x74] ss:$8 sps:$4 sm:$0xff]   ;;  %v2196_v3 = vld [vmem:[#allocation8 + $0x70] ss:$8 sps:$4 sm:$0xff]   ;;  %v450_v33 = vld [vmem:[%s2993_s24] sm:$0xff] }
  0x98   : > { %2701 = vsyncadd (%p3714_p12), [#allocation12], 4294965248  ;;  %618 = vmatprep.mubr.bf16.mxu0 %v2730_v0  ;;  %811 = vmatprep.mubr.bf16.mxu1 %v2730_v0  ;;  %v2194_v2 = vld [vmem:[#allocation7 + $0x74] ss:$8 sps:$4 sm:$0xff]   ;;  %v2197_v4 = vld [vmem:[#allocation7 + $0x70] ss:$8 sps:$4 sm:$0xff]  }
  0x99   : > { %586 = vmatprep.subr.bf16.mxu0 %v2192_v1  ;;  %779 = vmatprep.subr.bf16.mxu1 %v2194_v2  ;;  %v2198_v5 = vld [vmem:[#allocation8 + $0x64] ss:$8 sps:$4 sm:$0xff]   ;;  %v2202_v7 = vld [vmem:[#allocation8 + $0x60] ss:$8 sps:$4 sm:$0xff]   ;;  %v2204_v9 = vld [vmem:[#allocation8 + $0x54] ss:$8 sps:$4 sm:$0xff]  }
  0x9a   : > { %587 = vmatpush1.bf16.msra.mxu0 %v2196_v3  ;;  %780 = vmatpush1.bf16.msra.mxu1 %v2197_v4  ;;  %v2200_v6 = vld [vmem:[#allocation7 + $0x64] ss:$8 sps:$4 sm:$0xff]   ;;  %v2203_v8 = vld [vmem:[#allocation7 + $0x60] ss:$8 sps:$4 sm:$0xff]   ;;  %v2206_v10 = vld [vmem:[#allocation7 + $0x54] ss:$8 sps:$4 sm:$0xff]  }
  0x9b   : > { %588 = vmatprep.subr.bf16.mxu0 %v2198_v5  ;;  %781 = vmatprep.subr.bf16.mxu1 %v2200_v6  ;;  %v2208_v11 = vld [vmem:[#allocation8 + $0x50] ss:$8 sps:$4 sm:$0xff]   ;;  %v2210_v13 = vld [vmem:[#allocation8 + $0x44] ss:$8 sps:$4 sm:$0xff]   ;;  %v2214_v15 = vld [vmem:[#allocation8 + $0x40] ss:$8 sps:$4 sm:$0xff]  }
  0x9c   : > { %v2209_v12 = vld [vmem:[#allocation7 + $0x50] ss:$8 sps:$4 sm:$0xff]   ;;  %v2212_v14 = vld [vmem:[#allocation7 + $0x44] ss:$8 sps:$4 sm:$0xff]   ;;  %v2215_v16 = vld [vmem:[#allocation7 + $0x40] ss:$8 sps:$4 sm:$0xff]  }
  0x9d   : > { %v2216_v17 = vld [vmem:[#allocation8 + $0x34] ss:$8 sps:$4 sm:$0xff]   ;;  %v2220_v19 = vld [vmem:[#allocation8 + $0x30] ss:$8 sps:$4 sm:$0xff]   ;;  %v2222_v21 = vld [vmem:[#allocation8 + $0x24] ss:$8 sps:$4 sm:$0xff]  }
  0x9e   : > { %589 = vmatpush1.bf16.msra.mxu0 %v2202_v7  ;;  %782 = vmatpush1.bf16.msra.mxu1 %v2203_v8  ;;  %v2218_v18 = vld [vmem:[#allocation7 + $0x34] ss:$8 sps:$4 sm:$0xff]   ;;  %v2221_v20 = vld [vmem:[#allocation7 + $0x30] ss:$8 sps:$4 sm:$0xff]   ;;  %v2224_v22 = vld [vmem:[#allocation7 + $0x24] ss:$8 sps:$4 sm:$0xff]  }
  0x9f   : > { %590 = vmatprep.subr.bf16.mxu0 %v2204_v9  ;;  %783 = vmatprep.subr.bf16.mxu1 %v2206_v10  ;;  %v2226_v23 = vld [vmem:[#allocation8 + $0x20] ss:$8 sps:$4 sm:$0xff]   ;;  %v2228_v25 = vld [vmem:[#allocation8 + $0x14] ss:$8 sps:$4 sm:$0xff]   ;;  %v2232_v27 = vld [vmem:[#allocation8 + $0x10] ss:$8 sps:$4 sm:$0xff]  }
  0xa0   : > { %v2227_v24 = vld [vmem:[#allocation7 + $0x20] ss:$8 sps:$4 sm:$0xff]   ;;  %v2230_v26 = vld [vmem:[#allocation7 + $0x14] ss:$8 sps:$4 sm:$0xff]   ;;  %v2233_v28 = vld [vmem:[#allocation7 + $0x10] ss:$8 sps:$4 sm:$0xff]  }
  0xa1   : > { %v2234_v29 = vld [vmem:[#allocation8 + $0x4] ss:$8 sps:$4 sm:$0xff]   ;;  %v2238_v31 = vld [vmem:[#allocation8] ss:$8 sps:$4 sm:$0xff]   ;;  %v452_v39 = vld [vmem:[%s2993_s24 + $0x10] sm:$0xff]  ;;  %s3496_s6 = scalar_lea.vmem [#allocation13], %s2981_s18 }
  0xa2   : > { %591 = vmatpush1.bf16.msra.mxu0 %v2208_v11  ;;  %784 = vmatpush1.bf16.msra.mxu1 %v2209_v12  ;;  %v2236_v30 = vld [vmem:[#allocation7 + $0x4] ss:$8 sps:$4 sm:$0xff]   ;;  %v2239_v32 = vld [vmem:[#allocation7] ss:$8 sps:$4 sm:$0xff]   ;;  %v453_v40 = vld [vmem:[%s2993_s24 + $0x18] sm:$0xff]  ;;  %s2094_s19 = sshll.u32 %s2800_s9, 11 }
  0xa3   : > { %592 = vmatprep.subr.bf16.mxu0 %v2210_v13  ;;  %785 = vmatprep.subr.bf16.mxu1 %v2212_v14  ;;  %v451_v34 = vld [vmem:[%s2993_s24 + $0x8] sm:$0xff]  ;;  %v426_v35 = vld [vmem:[%s2985_s22] sm:$0xff]  ;;  %v428_v41 = vld [vmem:[%s2985_s22 + $0x10] sm:$0xff]  ;;  %v3026_v43 = vpack.c.bf16 %v453_v40, %v452_v39  ;;  %s1820_s21 = sshll.u32 %s3496_s6, 4  ;;  %s3627_s10 = scalar_lea.hbm %s3681_s8, %s2094_s19  ;;  %s3629_s21 = int_to_ptr.vmem [resolvable:$true] %s1820_s21 }
  0xa4   : > { %v427_v36 = vld [vmem:[%s2985_s22 + $0x8] sm:$0xff]  ;;  %v3017_v37 = vpack.c.bf16 %v451_v34, %v450_v33  ;;  %v429_v42 = vld [vmem:[%s2985_s22 + $0x18] sm:$0xff]  ;;  %v454_v45 = vld [vmem:[%s2993_s24 + $0x20] sm:$0xff]  ;;  %s1807_s23 = scalar_lea.sflag [#allocation4], %s2978_s0  ;;  %s2640_s18 = scalar_lea.vmem %s3629_s21, 2048 }
  0xa5   : > { %v442_v38 = vpack.c.bf16 %v427_v36, %v426_v35  ;;  %v443_v44 = vpack.c.bf16 %v429_v42, %v428_v41  ;;  %v455_v46 = vld [vmem:[%s2993_s24 + $0x28] sm:$0xff]  ;;  %v430_v47 = vld [vmem:[%s2985_s22 + $0x20] sm:$0xff]  ;;  %v456_v51 = vld [vmem:[%s2993_s24 + $0x30] sm:$0xff]  ;;  %p2641_p13 = scmp.ne.s32.totalorder %s3629_s21, %s2640_s18  ;;  %p3717_p10 = scmp.ne.s32.totalorder %s3703_s14, 0 }
  0xa6   : > { %593 = vmatpush1.bf16.msra.mxu0 %v2214_v15  ;;  %786 = vmatpush1.bf16.msra.mxu1 %v2215_v16  ;;  %v431_v48 = vld [vmem:[%s2985_s22 + $0x28] sm:$0xff]  ;;  %v3035_v49 = vpack.c.bf16 %v455_v46, %v454_v45  ;;  %v457_v52 = vld [vmem:[%s2993_s24 + $0x38] sm:$0xff]  ;;  %v432_v53 = vld [vmem:[%s2985_s22 + $0x30] sm:$0xff]  ;;  %s2731_s9 = smov [#allocation13]  }
  0xa7   : > { %594 = vmatprep.subr.bf16.mxu0 %v2216_v17  ;;  %787 = vmatprep.subr.bf16.mxu1 %v2218_v18  ;;  %v444_v50 = vpack.c.bf16 %v431_v48, %v430_v47  ;;  %v433_v54 = vld [vmem:[%s2985_s22 + $0x38] sm:$0xff]  ;;  %v3044_v55 = vpack.c.bf16 %v457_v52, %v456_v51  ;;  %v458_v57 = vld [vmem:[%s2993_s24 + $0x40] sm:$0xff]  ;;  %v459_v58 = vld [vmem:[%s2993_s24 + $0x48] sm:$0xff]  ;;  %p2642_p3 = pnand %p2641_p13, %p3717_p10  ;;  %s2644_s17 = sshll.u32 %s2731_s9, 4  ;;  %s2645_s17 = int_to_ptr.vmem [resolvable:$false] %s2644_s17 }
  0xa8   : > { %v445_v56 = vpack.c.bf16 %v433_v54, %v432_v53  ;;  %v434_v59 = vld [vmem:[%s2985_s22 + $0x40] sm:$0xff]  ;;  %v435_v60 = vld [vmem:[%s2985_s22 + $0x48] sm:$0xff]  ;;  %v3053_v61 = vpack.c.bf16 %v459_v58, %v458_v57  ;;  %v460_v63 = vld [vmem:[%s2993_s24 + $0x50] sm:$0xff]  ;;  %p2647_p4 = scmp.lt.s32.totalorder %s3629_s21, %s2645_s17 }
  0xa9   : > { %v446_v62 = vpack.c.bf16 %v435_v60, %v434_v59  ;;  %v461_v1 = vld [vmem:[%s2993_s24 + $0x58] sm:$0xff]  ;;  %v436_v2 = vld [vmem:[%s2985_s22 + $0x50] sm:$0xff]  ;;  %v462_v6 = vld [vmem:[%s2993_s24 + $0x60] sm:$0xff]  ;;  %p2643_p11 = pneg %p2642_p3 }
  0xaa   : > { %595 = vmatpush1.bf16.msra.mxu0 %v2220_v19  ;;  %788 = vmatpush1.bf16.msra.mxu1 %v2221_v20  ;;  %v437_v3 = vld [vmem:[%s2985_s22 + $0x58] sm:$0xff]  ;;  %v3062_v4 = vpack.c.bf16 %v461_v1, %v460_v63  ;;  %v463_v7 = vld [vmem:[%s2993_s24 + $0x68] sm:$0xff]  ;;  %v438_v8 = vld [vmem:[%s2985_s22 + $0x60] sm:$0xff] }
  0xab   : > { %596 = vmatprep.subr.bf16.mxu0 %v2222_v21  ;;  %789 = vmatprep.subr.bf16.mxu1 %v2224_v22  ;;  %v447_v5 = vpack.c.bf16 %v437_v3, %v436_v2  ;;  %v439_v9 = vld [vmem:[%s2985_s22 + $0x68] sm:$0xff]  ;;  %v3071_v10 = vpack.c.bf16 %v463_v7, %v462_v6  ;;  %v464_v12 = vld [vmem:[%s2993_s24 + $0x70] sm:$0xff]  ;;  %v465_v13 = vld [vmem:[%s2993_s24 + $0x78] sm:$0xff] }
  0xac   : > { %v448_v11 = vpack.c.bf16 %v439_v9, %v438_v8  ;;  %v440_v14 = vld [vmem:[%s2985_s22 + $0x70] sm:$0xff]  ;;  %v441_v15 = vld [vmem:[%s2985_s22 + $0x78] sm:$0xff]  ;;  %v3080_v16 = vpack.c.bf16 %v465_v13, %v464_v12  ;;  %v2248_v20 = vld [vmem:[#allocation11 + $0x64] ss:$8 sps:$4 sm:$0xff]   ;;  %s2646_s22 = scalar_lea.vmem %s2645_s17, 4096 }
  0xad   : > { %v449_v17 = vpack.c.bf16 %v441_v15, %v440_v14  ;;  %v2242_v18 = vld [vmem:[#allocation11 + $0x74] ss:$8 sps:$4 sm:$0xff]   ;;  %v2240_v19 = vld [vmem:[#allocation11 + $0x70] ss:$8 sps:$4 sm:$0xff]   ;;  %v2246_v21 = vld [vmem:[#allocation11 + $0x60] ss:$8 sps:$4 sm:$0xff]   ;;  %p2648_p6 = scmp.lt.s32.totalorder %s2646_s22, %s2640_s18 }
  0xae   : > { %597 = vmatpush1.bf16.msra.mxu0 %v2226_v23  ;;  %790 = vmatpush1.bf16.msra.mxu1 %v2227_v24  ;;  %v2245_v22 = vld [vmem:[#allocation10 + $0x74] ss:$8 sps:$4 sm:$0xff]   ;;  %v2243_v23 = vld [vmem:[#allocation10 + $0x70] ss:$8 sps:$4 sm:$0xff]   ;;  %v2263_v33 = vld [vmem:[#allocation10 + $0x44] ss:$8 sps:$4 sm:$0xff]  }
  0xaf   : > { %598 = vmatprep.subr.bf16.mxu0 %v2228_v25  ;;  %791 = vmatprep.subr.bf16.mxu1 %v2230_v26  ;;  %v2254_v24 = vld [vmem:[#allocation11 + $0x54] ss:$8 sps:$4 sm:$0xff]   ;;  %v2251_v25 = vld [vmem:[#allocation10 + $0x64] ss:$8 sps:$4 sm:$0xff]   ;;  %v2252_v26 = vld [vmem:[#allocation11 + $0x50] ss:$8 sps:$4 sm:$0xff]   ;;  %p2649_p5 = por %p2648_p6, %p2647_p4 }
  0xb0   : > { %v2264_v34 = vld [vmem:[#allocation11 + $0x30] ss:$8 sps:$4 sm:$0xff]   ;;  %v2261_v35 = vld [vmem:[#allocation10 + $0x40] ss:$8 sps:$4 sm:$0xff]   ;;  %v2272_v36 = vld [vmem:[#allocation11 + $0x24] ss:$8 sps:$4 sm:$0xff]  }
  0xb1   : > { %v2269_v39 = vld [vmem:[#allocation10 + $0x34] ss:$8 sps:$4 sm:$0xff]   ;;  %v2267_v40 = vld [vmem:[#allocation10 + $0x30] ss:$8 sps:$4 sm:$0xff]   ;;  %v2273_v45 = vld [vmem:[#allocation10 + $0x20] ss:$8 sps:$4 sm:$0xff]   ;;  %p2650_p0 = pnand %p2649_p5, %p2643_p11 }
  0xb2   : > { %599 = vmatpush1.bf16.msra.mxu0 %v2232_v27  ;;  %792 = vmatpush1.bf16.msra.mxu1 %v2233_v28  ;;  %v2249_v27 = vld [vmem:[#allocation10 + $0x60] ss:$8 sps:$4 sm:$0xff]   ;;  %v2260_v28 = vld [vmem:[#allocation11 + $0x44] ss:$8 sps:$4 sm:$0xff]   ;;  %v2278_v41 = vld [vmem:[#allocation11 + $0x14] ss:$8 sps:$4 sm:$0xff]  }
  0xb3   : > { %600 = vmatprep.subr.bf16.mxu0 %v2234_v29  ;;  %793 = vmatprep.subr.bf16.mxu1 %v2236_v30  ;;  %v2258_v29 = vld [vmem:[#allocation11 + $0x40] ss:$8 sps:$4 sm:$0xff]   ;;  %v2257_v30 = vld [vmem:[#allocation10 + $0x54] ss:$8 sps:$4 sm:$0xff]   ;;  %v2276_v42 = vld [vmem:[#allocation11 + $0x10] ss:$8 sps:$4 sm:$0xff]  }
  0xb4   : > { %v2284_v46 = vld [vmem:[#allocation11 + $0x4] ss:$8 sps:$4 sm:$0xff]   ;;  %v2282_v47 = vld [vmem:[#allocation11] ss:$8 sps:$4 sm:$0xff]   ;;  %v2281_v48 = vld [vmem:[#allocation10 + $0x14] ss:$8 sps:$4 sm:$0xff]  }
  0xb5   : > { %v2287_v51 = vld [vmem:[#allocation10 + $0x4] ss:$8 sps:$4 sm:$0xff]   ;;  %v2285_v52 = vld [vmem:[#allocation10] ss:$8 sps:$4 sm:$0xff]  }
  0xb6   : > { %601 = vmatpush1.bf16.msra.mxu0 %v2238_v31  ;;  %794 = vmatpush1.bf16.msra.mxu1 %v2239_v32  ;;  %v2255_v31 = vld [vmem:[#allocation10 + $0x50] ss:$8 sps:$4 sm:$0xff]   ;;  %v2266_v32 = vld [vmem:[#allocation11 + $0x34] ss:$8 sps:$4 sm:$0xff]  }
  0xb7   : > { %1296 = vmatprep.subr.bf16.mxu0 %v2242_v18  ;;  %1489 = vmatprep.subr.bf16.mxu1 %v2245_v22 }
  0xb9   : > { %619 = vmatmul.mubr.bf16.vlgmr.msra.gmra.mxu0 %v3017_v37  ;;  %812 = vmatmul.mubr.bf16.vlgmr.msra.gmra.mxu1 %v442_v38  ;;  %v2270_v38 = vld [vmem:[#allocation11 + $0x20] ss:$8 sps:$4 sm:$0xff]  }
  0xba   : > { %628 = vmatprep.mubr.bf16.mxu0 %v2730_v0  ;;  %821 = vmatprep.mubr.bf16.mxu1 %v2730_v0 }
  0xbb   : > { %1297 = vmatpush1.bf16.msra.mxu0 %v2240_v19  ;;  %1490 = vmatpush1.bf16.msra.mxu1 %v2243_v23 }
  0xbc   : > { %1298 = vmatprep.subr.bf16.mxu0 %v2248_v20  ;;  %1491 = vmatprep.subr.bf16.mxu1 %v2251_v25 }
  0xbf   : > { %1299 = vmatpush1.bf16.msra.mxu0 %v2246_v21  ;;  %1492 = vmatpush1.bf16.msra.mxu1 %v2249_v27 }
  0xc0   : > { %1300 = vmatprep.subr.bf16.mxu0 %v2254_v24  ;;  %1493 = vmatprep.subr.bf16.mxu1 %v2257_v30 }
  0xc1   : > { %629 = vmatmul.mubr.bf16.gmra.mxu0 %v3026_v43  ;;  %822 = vmatmul.mubr.bf16.gmra.mxu1 %v443_v44  ;;  %v2275_v44 = vld [vmem:[#allocation10 + $0x24] ss:$8 sps:$4 sm:$0xff]  }
  0xc2   : > { %638 = vmatprep.mubr.bf16.mxu0 %v2730_v0  ;;  %831 = vmatprep.mubr.bf16.mxu1 %v2730_v0 }
  0xc3   : > { %1301 = vmatpush1.bf16.msra.mxu0 %v2252_v26  ;;  %1494 = vmatpush1.bf16.msra.mxu1 %v2255_v31 }
  0xc4   : > { %1302 = vmatprep.subr.bf16.mxu0 %v2260_v28  ;;  %1495 = vmatprep.subr.bf16.mxu1 %v2263_v33 }
  0xc7   : > { %1303 = vmatpush1.bf16.msra.mxu0 %v2258_v29  ;;  %1496 = vmatpush1.bf16.msra.mxu1 %v2261_v35 }
  0xc8   : > { %1304 = vmatprep.subr.bf16.mxu0 %v2266_v32  ;;  %1497 = vmatprep.subr.bf16.mxu1 %v2269_v39 }
  0xc9   : > { %639 = vmatmul.mubr.bf16.gmra.mxu0 %v3035_v49  ;;  %832 = vmatmul.mubr.bf16.gmra.mxu1 %v444_v50  ;;  %v2279_v50 = vld [vmem:[#allocation10 + $0x10] ss:$8 sps:$4 sm:$0xff]  }
  0xca   : > { %648 = vmatprep.mubr.bf16.mxu0 %v2730_v0  ;;  %841 = vmatprep.mubr.bf16.mxu1 %v2730_v0 }
  0xcb   : > { %1305 = vmatpush1.bf16.msra.mxu0 %v2264_v34  ;;  %1498 = vmatpush1.bf16.msra.mxu1 %v2267_v40 }
  0xcc   : > { %1306 = vmatprep.subr.bf16.mxu0 %v2272_v36  ;;  %1499 = vmatprep.subr.bf16.mxu1 %v2275_v44 }
  0xcf   : > { %1307 = vmatpush1.bf16.msra.mxu0 %v2270_v38  ;;  %1500 = vmatpush1.bf16.msra.mxu1 %v2273_v45 }
  0xd0   : > { %1308 = vmatprep.subr.bf16.mxu0 %v2278_v41  ;;  %1501 = vmatprep.subr.bf16.mxu1 %v2281_v48 }
  0xd1   : > { %649 = vmatmul.mubr.bf16.gmra.mxu0 %v3044_v55  ;;  %842 = vmatmul.mubr.bf16.gmra.mxu1 %v445_v56 }
  0xd2   : > { %658 = vmatprep.mubr.bf16.mxu0 %v2730_v0  ;;  %851 = vmatprep.mubr.bf16.mxu1 %v2730_v0 }
  0xd3   : > { %1309 = vmatpush1.bf16.msra.mxu0 %v2276_v42  ;;  %1502 = vmatpush1.bf16.msra.mxu1 %v2279_v50 }
  0xd4   : > { %1310 = vmatprep.subr.bf16.mxu0 %v2284_v46  ;;  %1503 = vmatprep.subr.bf16.mxu1 %v2287_v51 }
  0xd7   : > { %1311 = vmatpush1.bf16.msra.mxu0 %v2282_v47  ;;  %1504 = vmatpush1.bf16.msra.mxu1 %v2285_v52 }
  0xd9   : > { %659 = vmatmul.mubr.bf16.gmra.mxu0 %v3053_v61  ;;  %852 = vmatmul.mubr.bf16.gmra.mxu1 %v446_v62 }
  0xda   : > { %668 = vmatprep.mubr.bf16.mxu0 %v2730_v0  ;;  %861 = vmatprep.mubr.bf16.mxu1 %v2730_v0 }
  0xe1   : > { %669 = vmatmul.mubr.bf16.gmra.mxu0 %v3062_v4  ;;  %862 = vmatmul.mubr.bf16.gmra.mxu1 %v447_v5 }
  0xe2   : > { %678 = vmatprep.mubr.bf16.mxu0 %v2730_v0  ;;  %871 = vmatprep.mubr.bf16.mxu1 %v2730_v0 }
  0xe9   : > { %679 = vmatmul.mubr.bf16.gmra.mxu0 %v3071_v10  ;;  %872 = vmatmul.mubr.bf16.gmra.mxu1 %v448_v11 }
  0xea   : > { %688 = vmatprep.mubr.bf16.mxu0 %v2730_v0  ;;  %881 = vmatprep.mubr.bf16.mxu1 %v2730_v0 }
  0xf1   : > { %689 = vmatmul.mubr.bf16.gmra.mxu0 %v3080_v16  ;;  %882 = vmatmul.mubr.bf16.gmra.mxu1 %v449_v17 }
  0xf2   : > { %1328 = vmatprep.mubr.bf16.mxu0 %v2730_v0  ;;  %1521 = vmatprep.mubr.bf16.mxu1 %v2730_v0 }
  0xf9   : > { %1329 = vmatmul.mubr.bf16.vlgmr.msra.gmra.mxu0 %v3017_v37  ;;  %v894_v37 = vlaneseq }
  0xfa   : > { %1338 = vmatprep.mubr.bf16.mxu0 %v2730_v0 }
 0x101   : > { %1339 = vmatmul.mubr.bf16.gmra.mxu0 %v3026_v43  ;;  %v3097_v43 = vshrl.u32 %v894_v37, 7 }
 0x102   : > { %1348 = vmatprep.mubr.bf16.mxu0 %v2730_v0 }
 0x103   : > { %v900_v53 = vsub.s32 1, %v3097_v43  ;;  %v896_v50 = vsub.s32 0, %v3097_v43 }
 0x109   : > { %1349 = vmatmul.mubr.bf16.gmra.mxu0 %v3035_v49 }
 0x10a   : > { %1358 = vmatprep.mubr.bf16.mxu0 %v2730_v0 }
 0x111   : > { %1359 = vmatmul.mubr.bf16.gmra.mxu0 %v3044_v55  ;;  %v3107_v55 = vld [vmem:[%s3677_s4] sm:$0x3] }
 0x112   : > { %1368 = vmatprep.mubr.bf16.mxu0 %v2730_v0  ;;  %v3113_v56 = vrot.slane %v3107_v55, %v900_v53 }
 0x119   : > { %1369 = vmatmul.mubr.bf16.gmra.mxu0 %v3053_v61 }
 0x11a   : > { %1378 = vmatprep.mubr.bf16.mxu0 %v2730_v0 }
 0x121   : > { %1379 = vmatmul.mubr.bf16.gmra.mxu0 %v3062_v4 }
 0x122   : > { %1388 = vmatprep.mubr.bf16.mxu0 %v2730_v0 }
 0x129   : > { %1389 = vmatmul.mubr.bf16.gmra.mxu0 %v3071_v10 }
 0x12a   : > { %1398 = vmatprep.mubr.bf16.mxu0 %v2730_v0 }
 0x131   : > { %1399 = vmatmul.mubr.bf16.gmra.mxu0 %v3080_v16 }
 0x179   : > { %v3100_v49 = vpop.f32.mrf.mxu0  ;;  %v3102_v54 = vpop.f32.mrf.mxu1 }
 0x17b   : > { %v622_v57 = vpop.f32.mrf.mxu0  ;;  %v815_v58 = vpop.f32.mrf.mxu1 }
 0x17c   : > { %v816_v59 = vadd.f32 %v815_v58, %v622_v57 }
 0x17d   : > { %v3116_v60 = vpop.f32.mrf.mxu0  ;;  %v3118_v61 = vpop.f32.mrf.mxu1 }
 0x17e   : > { %v3121_v62 = vadd.f32 %v3113_v56, %v816_v59 }
 0x17f   : > { %v626_v63 = vpop.f32.mrf.mxu0  ;;  %v819_v1 = vpop.f32.mrf.mxu1 }
 0x180   : > { %v2007_v2 = vmul.f32 -1.442695, %v3121_v62  ;;  %v820_v3 = vadd.f32 %v819_v1, %v626_v63 }
 0x181   : > { %v3124_v4 = vpop.f32.mrf.mxu0  ;;  %v3126_v5 = vpop.f32.mrf.mxu1 }
 0x182   : > { %2288 = vpow2.f32 %v2007_v2  ;;  %v3130_v6 = vadd.f32 %v3113_v56, %v820_v3  ;;  %v3184_v3 = vrot.slane %v3107_v55, %v896_v50 }
 0x183   : > { %v632_v7 = vpop.f32.mrf.mxu0  ;;  %v825_v8 = vpop.f32.mrf.mxu1 }
 0x184   : > { %v2008_v9 = vmul.f32 -1.442695, %v3130_v6  ;;  %v826_v10 = vadd.f32 %v825_v8, %v632_v7 }
 0x185   : > { %v3133_v11 = vpop.f32.mrf.mxu0  ;;  %v3135_v12 = vpop.f32.mrf.mxu1 }
 0x186   : > { %2290 = vpow2.f32 %v2008_v9  ;;  %v3138_v13 = vadd.f32 %v3113_v56, %v826_v10  ;;  %v814_v9 = vadd.f32 %v3102_v54, %v3100_v49 }
 0x187   : > { %v636_v14 = vpop.f32.mrf.mxu0  ;;  %v829_v15 = vpop.f32.mrf.mxu1 }
 0x188   : > { %v2009_v16 = vmul.f32 -1.442695, %v3138_v13  ;;  %v830_v17 = vadd.f32 %v829_v15, %v636_v14  ;;  %v904_v54 = vadd.f32 %v3184_v3, %v814_v9 }
 0x189   : > { %v3141_v18 = vpop.f32.mrf.mxu0  ;;  %v3143_v19 = vpop.f32.mrf.mxu1 }
 0x18a   : > { %2292 = vpow2.f32 %v2009_v16  ;;  %v3146_v20 = vadd.f32 %v3113_v56, %v830_v17 }
 0x18b   : > { %v642_v21 = vpop.f32.mrf.mxu0  ;;  %v835_v22 = vpop.f32.mrf.mxu1 }
 0x18c   : > { %v2010_v23 = vmul.f32 -1.442695, %v3146_v20  ;;  %v836_v24 = vadd.f32 %v835_v22, %v642_v21  ;;  %v818_v22 = vadd.f32 %v3118_v61, %v3116_v60 }
 0x18d   : > { %v3149_v25 = vpop.f32.mrf.mxu0  ;;  %v3151_v26 = vpop.f32.mrf.mxu1 }
 0x18e   : > { %2294 = vpow2.f32 %v2010_v23  ;;  %v3154_v27 = vadd.f32 %v3113_v56, %v836_v24 }
 0x18f   : > { %v2289_v28 = vpop.eup %2288  ;;  %v646_v29 = vpop.f32.mrf.mxu0 }
 0x190   : > { %v839_v30 = vpop.f32.mrf.mxu1  ;;  %v984_v31 = vadd.f32 1.0, %v2289_v28  ;;  %v2011_v32 = vmul.f32 -1.442695, %v3154_v27 }
 0x191   : > { %v840_v33 = vadd.f32 %v839_v30, %v646_v29  ;;  %v3157_v34 = vpop.f32.mrf.mxu0 }
 0x192   : > { %v3159_v35 = vpop.f32.mrf.mxu1  ;;  %2296 = vrcp.f32 %v984_v31 }
 0x193   : > { %v3162_v36 = vadd.f32 %v3113_v56, %v840_v33  ;;  %v2291_v38 = vpop.eup %2290  ;;  %2298 = vpow2.f32 %v2011_v32  ;;  %v652_v39 = vpop.f32.mrf.mxu0 }
 0x194   : > { %v845_v40 = vpop.f32.mrf.mxu1  ;;  %v985_v41 = vadd.f32 1.0, %v2291_v38 }
 0x195   : > { %v2012_v42 = vmul.f32 -1.442695, %v3162_v36  ;;  %v846_v44 = vadd.f32 %v845_v40, %v652_v39  ;;  %v3165_v45 = vpop.f32.mrf.mxu0  ;;  %v906_v39 = vadd.f32 %v3184_v3, %v818_v22 }
 0x196   : > { %v3167_v46 = vpop.f32.mrf.mxu1  ;;  %2300 = vrcp.f32 %v985_v41 }
 0x197   : > { %v3170_v47 = vadd.f32 %v3113_v56, %v846_v44  ;;  %v2293_v48 = vpop.eup %2292  ;;  %2302 = vpow2.f32 %v2012_v42  ;;  %v656_v51 = vpop.f32.mrf.mxu0 }
 0x198   : > { %v849_v52 = vpop.f32.mrf.mxu1  ;;  %v986_v37 = vadd.f32 1.0, %v2293_v48  ;;  %v824_v48 = vadd.f32 %v3126_v5, %v3124_v4 }
 0x199   : > { %v2013_v57 = vmul.f32 -1.442695, %v3170_v47  ;;  %v850_v58 = vadd.f32 %v849_v52, %v656_v51  ;;  %v3174_v59 = vpop.f32.mrf.mxu0 }
 0x19a   : > { %v3176_v63 = vpop.f32.mrf.mxu1  ;;  %2304 = vrcp.f32 %v986_v37 }
 0x19b   : > { %v3179_v1 = vadd.f32 %v3113_v56, %v850_v58  ;;  %v2295_v2 = vpop.eup %2294  ;;  %2306 = vpow2.f32 %v2013_v57  ;;  %v662_v7 = vpop.f32.mrf.mxu0 }
 0x19c   : > { %v855_v8 = vpop.f32.mrf.mxu1  ;;  %v987_v10 = vadd.f32 1.0, %v2295_v2 }
 0x19d   : > { %v2014_v14 = vmul.f32 -1.442695, %v3179_v1  ;;  %v856_v15 = vadd.f32 %v855_v8, %v662_v7  ;;  %v3189_v16 = vpop.f32.mrf.mxu0  ;;  %v828_v8 = vadd.f32 %v3135_v12, %v3133_v11 }
 0x19e   : > { %v3191_v17 = vpop.f32.mrf.mxu1  ;;  %2308 = vrcp.f32 %v987_v10 }
 0x19f   : > { %v3194_v21 = vadd.f32 %v3113_v56, %v856_v15  ;;  %v2297_v55 = vpop.eup %2296  ;;  %2310 = vpow2.f32 %v2014_v14  ;;  %v666_v23 = vpop.f32.mrf.mxu0  ;;  %v908_v14 = vadd.f32 %v3184_v3, %v824_v48 }
 0x1a0   : > { %v859_v24 = vpop.f32.mrf.mxu1  ;;  %v2299_v49 = vpop.eup %2298  ;;  %v1032_v28 = vmul.f32 %v2297_v55, %v3121_v62 }
 0x1a1   : > { %v2015_v29 = vmul.f32 -1.442695, %v3194_v21  ;;  %v860_v30 = vadd.f32 %v859_v24, %v666_v23  ;;  %v988_v31 = vadd.f32 1.0, %v2299_v49  ;;  %v3201_v32 = vpop.f32.mrf.mxu0 }
 0x1a2   : > { %v3203_v33 = vpop.f32.mrf.mxu1  ;;  %v3205_v38 = vmul.f32 %v1032_v28, %v904_v54  ;;  %v910_v54 = vadd.f32 %v3184_v3, %v828_v8 }
 0x1a3   : > { %2312 = vpow2.f32 %v2015_v29  ;;  %v3208_v60 = vadd.f32 %v3113_v56, %v860_v30  ;;  %v2301_v61 = vpop.eup %2300  ;;  %v672_v40 = vpop.f32.mrf.mxu0 }
 0x1a4   : > { %2314 = vrcp.f32 %v988_v31  ;;  %v865_v62 = vpop.f32.mrf.mxu1  ;;  %v2303_v41 = vpop.eup %2302  ;;  %v2023_v42 = vmul.f32 -1.442695, %v3205_v38  ;;  %v1033_v44 = vmul.f32 %v2301_v61, %v3130_v6 }
 0x1a5   : > { %v2016_v51 = vmul.f32 -1.442695, %v3208_v60  ;;  %v989_v52 = vadd.f32 1.0, %v2303_v41  ;;  %v866_v37 = vadd.f32 %v865_v62, %v672_v40  ;;  %v3216_v57 = vpop.f32.mrf.mxu0 }
 0x1a6   : > { %v3218_v58 = vpop.f32.mrf.mxu1  ;;  %2316 = vpow2.f32 %v2023_v42  ;;  %v3220_v2 = vmul.f32 %v1033_v44, %v906_v39  ;;  %v834_v39 = vadd.f32 %v3143_v19, %v3141_v18 }
 0x1a7   : > { %v2305_v7 = vpop.eup %2304  ;;  %2318 = vrcp.f32 %v989_v52  ;;  %v3225_v6 = vadd.f32 %v3113_v56, %v866_v37  ;;  %v676_v4 = vpop.f32.mrf.mxu0 }
 0x1a8   : > { %v869_v5 = vpop.f32.mrf.mxu1  ;;  %v2307_v9 = vpop.eup %2306  ;;  %v2024_v10 = vmul.f32 -1.442695, %v3220_v2  ;;  %v1034_v15 = vmul.f32 %v2305_v7, %v3138_v13  ;;  %2320 = vpow2.f32 %v2016_v51  ;;  %v912_v7 = vadd.f32 %v3184_v3, %v834_v39 }
 0x1a9   : > { %v990_v55 = vadd.f32 1.0, %v2307_v9  ;;  %v2017_v22 = vmul.f32 -1.442695, %v3225_v6  ;;  %v870_v23 = vadd.f32 %v869_v5, %v676_v4  ;;  %v3231_v24 = vpop.f32.mrf.mxu0  ;;  %v838_v5 = vadd.f32 %v3151_v26, %v3149_v25 }
 0x1aa   : > { %v3233_v11 = vpop.f32.mrf.mxu1  ;;  %2322 = vpow2.f32 %v2024_v10  ;;  %v3235_v12 = vmul.f32 %v1034_v15, %v908_v14 }
 0x1ab   : > { %v2309_v49 = vpop.eup %2308  ;;  %2324 = vrcp.f32 %v990_v55  ;;  %v3239_v28 = vadd.f32 %v3113_v56, %v870_v23  ;;  %v682_v13 = vpop.f32.mrf.mxu0  ;;  %v844_v23 = vadd.f32 %v3159_v35, %v3157_v34 }
 0x1ac   : > { %v875_v29 = vpop.f32.mrf.mxu1  ;;  %v2311_v30 = vpop.eup %2310  ;;  %v2025_v31 = vmul.f32 -1.442695, %v3235_v12  ;;  %v1035_v61 = vmul.f32 %v2309_v49, %v3146_v20  ;;  %2326 = vpow2.f32 %v2017_v22 }
 0x1ad   : > { %v991_v40 = vadd.f32 1.0, %v2311_v30  ;;  %v2018_v62 = vmul.f32 -1.442695, %v3239_v28  ;;  %v876_v41 = vadd.f32 %v875_v29, %v682_v13  ;;  %v3246_v42 = vpop.f32.mrf.mxu0 }
 0x1ae   : > { %v3248_v44 = vpop.f32.mrf.mxu1  ;;  %2328 = vpow2.f32 %v2025_v31  ;;  %v3250_v48 = vmul.f32 %v1035_v61, %v910_v54  ;;  %v914_v31 = vadd.f32 %v3184_v3, %v838_v5 }
 0x1af   : > { %2330 = vrcp.f32 %v991_v40  ;;  %v3253_v52 = vadd.f32 %v3113_v56, %v876_v41  ;;  %v686_v20 = vpop.f32.mrf.mxu0 }
 0x1b0   : > { %v2313_v51 = vpop.eup %2312  ;;  %v879_v37 = vpop.f32.mrf.mxu1  ;;  %v2026_v19 = vmul.f32 -1.442695, %v3250_v48  ;;  %2332 = vpow2.f32 %v2018_v62 }
 0x1b1   : > { %v2315_v18 = vpop.eup %2314  ;;  %v992_v8 = vadd.f32 1.0, %v2313_v51  ;;  %v2019_v9 = vmul.f32 -1.442695, %v3253_v52  ;;  %v880_v10 = vadd.f32 %v879_v37, %v686_v20  ;;  %v3261_v14 = vpop.f32.mrf.mxu0  ;;  %v916_v20 = vadd.f32 %v3184_v3, %v844_v23 }
 0x1b2   : > { %v1036_v4 = vmul.f32 %v2315_v18, %v3154_v27  ;;  %v3263_v15 = vpop.f32.mrf.mxu1  ;;  %2334 = vpow2.f32 %v2026_v19 }
 0x1b3   : > { %v2317_v55 = vpop.eup %2316  ;;  %2336 = vrcp.f32 %v992_v8  ;;  %v3270_v27 = vadd.f32 %v3113_v56, %v880_v10  ;;  %v692_v49 = vpop.f32.mrf.mxu0 }
 0x1b4   : > { %v3265_v22 = vmul.f32 %v1036_v4, %v912_v7  ;;  %v885_v25 = vpop.f32.mrf.mxu1  ;;  %v2319_v26 = vpop.eup %2318  ;;  %v1112_v54 = vadd.f32 1.0, %v2317_v55  ;;  %2338 = vpow2.f32 %v2019_v9  ;;  %v848_v7 = vadd.f32 %v3167_v46, %v3165_v45 }
 0x1b5   : > { %v886_v13 = vadd.f32 %v885_v25, %v692_v49  ;;  %v2321_v29 = vpop.eup %2320  ;;  %v1037_v61 = vmul.f32 %v2319_v26, %v3162_v36  ;;  %v2020_v39 = vmul.f32 -1.442695, %v3270_v27  ;;  %v3276_v34 = vpop.f32.mrf.mxu0 }
 0x1b6   : > { %v2027_v30 = vmul.f32 -1.442695, %v3265_v22  ;;  %v3278_v35 = vpop.f32.mrf.mxu1  ;;  %2340 = vrcp.f32 %v1112_v54  ;;  %v993_v40 = vadd.f32 1.0, %v2321_v29  ;;  %v918_v26 = vadd.f32 %v3184_v3, %v848_v7 }
 0x1b7   : > { %v3281_v62 = vadd.f32 %v3113_v56, %v886_v13  ;;  %v2323_v41 = vpop.eup %2322  ;;  %v3283_v51 = vmul.f32 %v1037_v61, %v914_v31  ;;  %v696_v37 = vpop.f32.mrf.mxu0  ;;  %v854_v54 = vadd.f32 %v3176_v63, %v3174_v59 }
 0x1b8   : > { %2342 = vpow2.f32 %v2027_v30  ;;  %v889_v18 = vpop.f32.mrf.mxu1  ;;  %v2325_v36 = vpop.eup %2324  ;;  %v1113_v19 = vadd.f32 1.0, %v2323_v41 }
 0x1b9   : > { %2344 = vrcp.f32 %v993_v40  ;;  %v2021_v8 = vmul.f32 -1.442695, %v3281_v62  ;;  %v2327_v4 = vpop.eup %2326  ;;  %v2028_v5 = vmul.f32 -1.442695, %v3283_v51  ;;  %v1038_v9 = vmul.f32 %v2325_v36, %v3170_v47 }
 0x1ba   : > { %2346 = vpow2.f32 %v2020_v39  ;;  %v890_v10 = vadd.f32 %v889_v18, %v696_v37  ;;  %v994_v55 = vadd.f32 1.0, %v2327_v4  ;;  %v920_v63 = vadd.f32 %v3184_v3, %v854_v54 }
 0x1bb   : > { %2348 = vrcp.f32 %v1113_v19  ;;  %v2329_v23 = vpop.eup %2328  ;;  %v3291_v49 = vmul.f32 %v1038_v9, %v916_v20 }
 0x1bc   : > { %2350 = vpow2.f32 %v2028_v5  ;;  %v3294_v25 = vadd.f32 %v3113_v56, %v890_v10  ;;  %v2331_v45 = vpop.eup %2330  ;;  %v1114_v46 = vadd.f32 1.0, %v2329_v23  ;;  %v864_v5 = vadd.f32 %v3203_v33, %v3201_v32 }
 0x1bd   : > { %2352 = vrcp.f32 %v994_v55  ;;  %v2333_v47 = vpop.eup %2332  ;;  %v2029_v13 = vmul.f32 -1.442695, %v3291_v49  ;;  %v1039_v29 = vmul.f32 %v2331_v45, %v3179_v1  ;;  %v858_v1 = vadd.f32 %v3191_v17, %v3189_v16 }
 0x1be   : > { %2354 = vpow2.f32 %v2021_v8  ;;  %v2022_v30 = vmul.f32 -1.442695, %v3294_v25  ;;  %v995_v31 = vadd.f32 1.0, %v2333_v47  ;;  %v924_v32 = vadd.f32 %v3184_v3, %v864_v5 }
 0x1bf   : > { %2356 = vrcp.f32 %v1114_v46  ;;  %v2335_v56 = vpop.eup %2334  ;;  %v3302_v61 = vmul.f32 %v1039_v29, %v918_v26  ;;  %v922_v9 = vadd.f32 %v3184_v3, %v858_v1 }
 0x1c0   : > { %2358 = vpow2.f32 %v2029_v13  ;;  %v2337_v39 = vpop.eup %2336  ;;  %v1115_v40 = vadd.f32 1.0, %v2335_v56  ;;  %v868_v13 = vadd.f32 %v3218_v58, %v3216_v57  ;;  %v874_v58 = vadd.f32 %v3233_v11, %v3231_v24 }
 0x1c1   : > { %2360 = vrcp.f32 %v995_v31  ;;  %v2339_v41 = vpop.eup %2338  ;;  %v2030_v59 = vmul.f32 -1.442695, %v3302_v61  ;;  %v1040_v20 = vmul.f32 %v2337_v39, %v3194_v21 }
 0x1c2   : > { %2362 = vpow2.f32 %v2022_v30  ;;  %v996_v37 = vadd.f32 1.0, %v2339_v41 }
 0x1c3   : > { %2364 = vrcp.f32 %v1115_v40  ;;  %v2341_v18 = vpop.eup %2340  ;;  %v3309_v36 = vmul.f32 %v1040_v20, %v920_v63  ;;  %v926_v63 = vadd.f32 %v3184_v3, %v868_v13 }
 0x1c4   : > { %2366 = vpow2.f32 %v2030_v59  ;;  %v1160_v23 = vmul.f32 %v2341_v18, %v3205_v38 }
 0x1c5   : > { %v2343_v19 = vpop.eup %2342  ;;  %2368 = vrcp.f32 %v996_v37  ;;  %v2031_v4 = vmul.f32 -1.442695, %v3309_v36 }
 0x1c6   : > { %v2345_v7 = vpop.eup %2344  ;;  %v1116_v8 = vadd.f32 1.0, %v2343_v19 }
 0x1c7   : > { %v2347_v21 = vpop.eup %2346  ;;  %v1041_v10 = vmul.f32 %v2345_v7, %v3208_v60 }
 0x1c8   : > { %v2349_v16 = vpop.eup %2348  ;;  %2370 = vrcp.f32 %v1116_v8  ;;  %v997_v17 = vadd.f32 1.0, %v2347_v21  ;;  %v878_v21 = vadd.f32 %v3248_v44, %v3246_v42 }
 0x1c9   : > { %v2351_v55 = vpop.eup %2350  ;;  %v1161_v45 = vmul.f32 %v2349_v16, %v3220_v2  ;;  %2372 = vpow2.f32 %v2031_v4  ;;  %v3318_v46 = vmul.f32 %v1041_v10, %v922_v9 }
 0x1ca   : > { %v2353_v26 = vpop.eup %2352  ;;  %v1117_v54 = vadd.f32 1.0, %v2351_v55  ;;  %2374 = vrcp.f32 %v997_v17 }
 0x1cb   : > { %v2355_v33 = vpop.eup %2354  ;;  %v2032_v47 = vmul.f32 -1.442695, %v3318_v46  ;;  %v1042_v60 = vmul.f32 %v2353_v26, %v3225_v6  ;;  %v1176_v29 = vpack.c.bf16 %v1161_v45, %v1160_v23  ;;  %v930_v45 = vadd.f32 %v3184_v3, %v878_v21 }
 0x1cc   : > { %v2357_v30 = vpop.eup %2356  ;;  %2376 = vrcp.f32 %v1117_v54  ;;  %v998_v31 = vadd.f32 1.0, %v2355_v33 }
 0x1cd   : > { %v2359_v56 = vpop.eup %2358  ;;  %2378 = vpow2.f32 %v2032_v47  ;;  %v3325_v39 = vmul.f32 %v1042_v60, %v924_v32  ;;  %1522 = vmatmul.mubr.bf16.vlgmr.msra.gmra.mxu1 %v1176_v29  ;;  %v1162_v19 = vmul.f32 %v2357_v30, %v3235_v12 }
 0x1ce   : > { %v2361_v40 = vpop.eup %2360  ;;  %v1118_v41 = vadd.f32 1.0, %v2359_v56  ;;  %2380 = vrcp.f32 %v998_v31  ;;  %1531 = vmatprep.mubr.bf16.mxu1 %v2730_v0 }
 0x1cf   : > { %v2363_v59 = vpop.eup %2362  ;;  %v2033_v6 = vmul.f32 -1.442695, %v3325_v39  ;;  %v1043_v57 = vmul.f32 %v2361_v40, %v3239_v28  ;;  %v928_v28 = vadd.f32 %v3184_v3, %v874_v58 }
 0x1d0   : > { %v2365_v20 = vpop.eup %2364  ;;  %2382 = vrcp.f32 %v1118_v41  ;;  %v999_v1 = vadd.f32 1.0, %v2363_v59 }
 0x1d1   : > { %v2367_v37 = vpop.eup %2366  ;;  %2384 = vpow2.f32 %v2033_v6  ;;  %v3333_v18 = vmul.f32 %v1043_v57, %v926_v63  ;;  %v1163_v7 = vmul.f32 %v2365_v20, %v3250_v48 }
 0x1d2   : > { %v2369_v8 = vpop.eup %2368  ;;  %v1119_v4 = vadd.f32 1.0, %v2367_v37  ;;  %2386 = vrcp.f32 %v999_v1 }
 0x1d3   : > { %v2034_v5 = vmul.f32 -1.442695, %v3333_v18  ;;  %v1044_v24 = vmul.f32 %v2369_v8, %v3253_v52  ;;  %v1177_v11 = vpack.c.bf16 %v1163_v7, %v1162_v19  ;;  %v884_v52 = vadd.f32 %v3263_v15, %v3261_v14 }
 0x1d4   : > { %2388 = vrcp.f32 %v1119_v4 }
 0x1d5   : > { %v2371_v9 = vpop.eup %2370  ;;  %2390 = vpow2.f32 %v2034_v5  ;;  %v3342_v10 = vmul.f32 %v1044_v24, %v928_v28  ;;  %1532 = vmatmul.mubr.bf16.gmra.mxu1 %v1177_v11  ;;  %v932_v13 = vadd.f32 %v3184_v3, %v884_v52 }
 0x1d6   : > { %v2373_v16 = vpop.eup %2372  ;;  %1541 = vmatprep.mubr.bf16.mxu1 %v2730_v0  ;;  %v1164_v32 = vmul.f32 %v2371_v9, %v3265_v22 }
 0x1d7   : > { %v2375_v17 = vpop.eup %2374  ;;  %v1120_v55 = vadd.f32 1.0, %v2373_v16  ;;  %v2035_v23 = vmul.f32 -1.442695, %v3342_v10 }
 0x1d8   : > { %v1045_v26 = vmul.f32 %v2375_v17, %v3270_v27  ;;  %v888_v27 = vadd.f32 %v3278_v35, %v3276_v34 }
 0x1d9   : > { %v2377_v42 = vpop.eup %2376  ;;  %2392 = vpow2.f32 %v2035_v23 }
 0x1da   : > { %v2379_v44 = vpop.eup %2378  ;;  %v3350_v54 = vmul.f32 %v1045_v26, %v930_v45  ;;  %v1165_v33 = vmul.f32 %v2377_v42, %v3283_v51  ;;  %2394 = vrcp.f32 %v1120_v55  ;;  %v934_v6 = vadd.f32 %v3184_v3, %v888_v27  ;;  %v3382_v27 = vpop.f32.mrf.mxu0 }
 0x1db   : > { %v2381_v47 = vpop.eup %2380  ;;  %v1121_v60 = vadd.f32 1.0, %v2379_v44 }
 0x1dc   : > { %v2036_v14 = vmul.f32 -1.442695, %v3350_v54  ;;  %v1046_v15 = vmul.f32 %v2381_v47, %v3281_v62  ;;  %v1178_v29 = vpack.c.bf16 %v1165_v33, %v1164_v32 }
 0x1dd   : > { %v2383_v30 = vpop.eup %2382  ;;  %2396 = vrcp.f32 %v1121_v60 }
 0x1de   : > { %v2385_v31 = vpop.eup %2384  ;;  %2398 = vpow2.f32 %v2036_v14  ;;  %v3359_v56 = vmul.f32 %v1046_v15, %v932_v13  ;;  %1542 = vmatmul.mubr.bf16.gmra.mxu1 %v1178_v29  ;;  %v1166_v57 = vmul.f32 %v2383_v30, %v3291_v49  ;;  %v1332_v29 = vpop.f32.mrf.mxu0 }
 0x1df   : > { %v2387_v40 = vpop.eup %2386  ;;  %v1122_v41 = vadd.f32 1.0, %v2385_v31  ;;  %1551 = vmatprep.mubr.bf16.mxu1 %v2730_v0 }
 0x1e0   : > { %v2037_v59 = vmul.f32 -1.442695, %v3359_v56  ;;  %v1047_v62 = vmul.f32 %v2387_v40, %v3294_v25  ;;  %v3384_v30 = vpop.f32.mrf.mxu0 }
 0x1e1   : > { %v2389_v63 = vpop.eup %2388 }
 0x1e2   : > { %v2391_v34 = vpop.eup %2390  ;;  %2400 = vpow2.f32 %v2037_v59  ;;  %v3365_v35 = vmul.f32 %v1047_v62, %v934_v6  ;;  %v1167_v58 = vmul.f32 %v2389_v63, %v3302_v61  ;;  %v1336_v31 = vpop.f32.mrf.mxu0 }
 0x1e3   : > { %2402 = vrcp.f32 %v1122_v41  ;;  %v1123_v20 = vadd.f32 1.0, %v2391_v34 }
 0x1e4   : > { %3715 = vst [vmem:[#allocation20_spill] sm:$0xff] %v3365_v35  ;;  %v2038_v1 = vmul.f32 -1.442695, %v3365_v35  ;;  %v1179_v37 = vpack.c.bf16 %v1167_v58, %v1166_v57  ;;  %v3386_v40 = vpop.f32.mrf.mxu0 }
 0x1e5   : > { %2404 = vrcp.f32 %v1123_v20 }
 0x1e6   : > { %2406 = vpow2.f32 %v2038_v1  ;;  %1552 = vmatmul.mubr.bf16.gmra.mxu1 %v1179_v37  ;;  %v2393_v3 = vpop.eup %2392  ;;  %v1342_v41 = vpop.f32.mrf.mxu0  ;;  %v3403_v37 = vld [vmem:[%s3680_s7] sm:$0x3] }
 0x1e7   : > { %1561 = vmatprep.mubr.bf16.mxu1 %v2730_v0  ;;  %v2395_v25 = vpop.eup %2394  ;;  %v1124_v19 = vadd.f32 1.0, %v2393_v3  ;;  %v3408_v3 = vrot.slane %v3403_v37, %v900_v53 }
 0x1e8   : > { %v1168_v4 = vmul.f32 %v2395_v25, %v3309_v36  ;;  %v3388_v59 = vpop.f32.mrf.mxu0 }
 0x1e9   : > { %2408 = vrcp.f32 %v1124_v19 }
 0x1ea   : > { %v2397_v7 = vpop.eup %2396  ;;  %v1346_v6 = vpop.f32.mrf.mxu0 }
 0x1eb   : > { %v2399_v8 = vpop.eup %2398  ;;  %v1169_v5 = vmul.f32 %v2397_v7, %v3318_v46 }
 0x1ec   : > { %v1125_v28 = vadd.f32 1.0, %v2399_v8 }
 0x1ed   : > { %v1180_v24 = vpack.c.bf16 %v1169_v5, %v1168_v4 }
 0x1ee   : > { %2410 = vrcp.f32 %v1125_v28 }
 0x1ef   : > { %v2401_v11 = vpop.eup %2400  ;;  %1562 = vmatmul.mubr.bf16.gmra.mxu1 %v1180_v24 }
 0x1f0   : > { %v2403_v21 = vpop.eup %2402  ;;  %v1126_v9 = vadd.f32 1.0, %v2401_v11  ;;  %1571 = vmatprep.mubr.bf16.mxu1 %v2730_v0 }
 0x1f1   : > { %v1170_v55 = vmul.f32 %v2403_v21, %v3325_v39 }
 0x1f2   : > { %v2405_v16 = vpop.eup %2404  ;;  %2412 = vrcp.f32 %v1126_v9 }
 0x1f3   : > { %v2407_v17 = vpop.eup %2406  ;;  %v1171_v23 = vmul.f32 %v2405_v16, %v3333_v18 }
 0x1f4   : > { %v1127_v52 = vadd.f32 1.0, %v2407_v17 }
 0x1f5   : > { %v1181_v45 = vpack.c.bf16 %v1171_v23, %v1170_v55 }
 0x1f6   : > { %2414 = vrcp.f32 %v1127_v52  ;;  %v2409_v26 = vpop.eup %2408 }
 0x1f7   : > { %1572 = vmatmul.mubr.bf16.gmra.mxu1 %v1181_v45  ;;  %v1172_v44 = vmul.f32 %v2409_v26, %v3342_v10 }
 0x1f8   : > { %1581 = vmatprep.mubr.bf16.mxu1 %v2730_v0 }
 0x1fb   : > { %v2411_v42 = vpop.eup %2410 }
 0x1fc   : > { %v1173_v32 = vmul.f32 %v2411_v42, %v3350_v54 }
 0x1fe   : > { %v1182_v33 = vpack.c.bf16 %v1173_v32, %v1172_v44 }
 0x1ff   : > { %v2413_v47 = vpop.eup %2412 }
 0x200   : > { %1582 = vmatmul.mubr.bf16.gmra.mxu1 %v1182_v33  ;;  %v1174_v13 = vmul.f32 %v2413_v47, %v3359_v56 }
 0x201   : > { %1591 = vmatprep.mubr.bf16.mxu1 %v2730_v0  ;;  %v3390_v0 = vpop.f32.mrf.mxu0 }
 0x203   : > { %v2415_v60 = vpop.eup %2414  ;;  %v1352_v62 = vpop.f32.mrf.mxu0 }
 0x204   : > { %v1175_v14 = vmul.f32 %v2415_v60, %v3365_v35 }
 0x205   : > { %v3392_v63 = vpop.f32.mrf.mxu0 }
 0x206   : > { %v1183_v15 = vpack.c.bf16 %v1175_v14, %v1174_v13 }
 0x207   : > { %v1356_v34 = vpop.f32.mrf.mxu0 }
 0x208   : > { %1592 = vmatmul.mubr.bf16.gmra.mxu1 %v1183_v15 }
 0x209   : > { %v3394_v57 = vpop.f32.mrf.mxu0 }
 0x20b   : > { %v1362_v58 = vpop.f32.mrf.mxu0 }
 0x20d   : > { %v3396_v20 = vpop.f32.mrf.mxu0 }
 0x20f   : > { %v1366_v25 = vpop.f32.mrf.mxu0 }
 0x211   : > { %v3415_v5 = vpop.f32.mrf.mxu0 }
 0x213   : > { %v1372_v9 = vpop.f32.mrf.mxu0 }
 0x215   : > { %v3429_v45 = vpop.f32.mrf.mxu0 }
 0x217   : > { %v1376_v47 = vpop.f32.mrf.mxu0 }
 0x28d   : > { %v3398_v1 = vpop.f32.mrf.mxu1 }
 0x28f   : > { %v1525_v19 = vpop.f32.mrf.mxu1 }
 0x290   : > { %v1526_v7 = vadd.f32 %v1525_v19, %v1332_v29  ;;  %v3440_v29 = vpop.f32.mrf.mxu0 }
 0x291   : > { %v3410_v8 = vpop.f32.mrf.mxu1 }
 0x292   : > { %v3413_v4 = vadd.f32 %v3408_v3, %v1526_v7 }
 0x293   : > { %v1529_v28 = vpop.f32.mrf.mxu1 }
 0x294   : > { %v2071_v24 = vmul.f32 -1.442695, %v3413_v4  ;;  %v1530_v11 = vadd.f32 %v1529_v28, %v1336_v31 }
 0x295   : > { %v3418_v21 = vpop.f32.mrf.mxu1 }
 0x296   : > { %2416 = vpow2.f32 %v2071_v24  ;;  %v3421_v53 = vadd.f32 %v3408_v3, %v1530_v11  ;;  %v1382_v11 = vpop.f32.mrf.mxu0 }
 0x297   : > { %v1535_v16 = vpop.f32.mrf.mxu1 }
 0x298   : > { %v2072_v17 = vmul.f32 -1.442695, %v3421_v53  ;;  %v1536_v55 = vadd.f32 %v1535_v16, %v1342_v41 }
 0x299   : > { %v3424_v23 = vpop.f32.mrf.mxu1 }
 0x29a   : > { %2418 = vpow2.f32 %v2072_v17  ;;  %v3427_v52 = vadd.f32 %v3408_v3, %v1536_v55 }
 0x29b   : > { %v1539_v26 = vpop.f32.mrf.mxu1 }
 0x29c   : > { %v2073_v42 = vmul.f32 -1.442695, %v3427_v52  ;;  %v1540_v44 = vadd.f32 %v1539_v26, %v1346_v6 }
 0x29e   : > { %2420 = vpow2.f32 %v2073_v42  ;;  %v3433_v32 = vadd.f32 %v3408_v3, %v1540_v44  ;;  %v3435_v33 = vpop.f32.mrf.mxu1 }
 0x2a0   : > { %v2074_v60 = vmul.f32 -1.442695, %v3433_v32  ;;  %v1545_v13 = vpop.f32.mrf.mxu1 }
 0x2a1   : > { %v1546_v14 = vadd.f32 %v1545_v13, %v1352_v62 }
 0x2a2   : > { %2422 = vpow2.f32 %v2074_v60  ;;  %v3438_v15 = vpop.f32.mrf.mxu1  ;;  %v3454_v60 = vpop.f32.mrf.mxu0 }
 0x2a3   : > { %v2417_v31 = vpop.eup %2416  ;;  %v3443_v41 = vadd.f32 %v3408_v3, %v1546_v14 }
 0x2a4   : > { %v1694_v6 = vadd.f32 1.0, %v2417_v31  ;;  %v1549_v19 = vpop.f32.mrf.mxu1 }
 0x2a5   : > { %v2075_v7 = vmul.f32 -1.442695, %v3443_v41  ;;  %v1550_v28 = vadd.f32 %v1549_v19, %v1356_v34 }
 0x2a6   : > { %2424 = vrcp.f32 %v1694_v6  ;;  %v3446_v24 = vpop.f32.mrf.mxu1 }
 0x2a7   : > { %v2419_v16 = vpop.eup %2418  ;;  %2426 = vpow2.f32 %v2075_v7  ;;  %v3449_v62 = vadd.f32 %v3408_v3, %v1550_v28  ;;  %v1386_v7 = vpop.f32.mrf.mxu0 }
 0x2a8   : > { %v1695_v17 = vadd.f32 1.0, %v2419_v16  ;;  %v1555_v55 = vpop.f32.mrf.mxu1 }
 0x2a9   : > { %v2076_v26 = vmul.f32 -1.442695, %v3449_v62  ;;  %v1556_v42 = vadd.f32 %v1555_v55, %v1362_v58  ;;  %v3470_v55 = vrot.slane %v3403_v37, %v896_v50 }
 0x2aa   : > { %2428 = vrcp.f32 %v1695_v17  ;;  %v3452_v44 = vpop.f32.mrf.mxu1  ;;  %v1524_v17 = vadd.f32 %v3398_v1, %v3382_v27 }
 0x2ab   : > { %v2421_v34 = vpop.eup %2420  ;;  %2430 = vpow2.f32 %v2076_v26  ;;  %v3457_v13 = vadd.f32 %v3408_v3, %v1556_v42 }
 0x2ac   : > { %v1696_v14 = vadd.f32 1.0, %v2421_v34  ;;  %v1559_v31 = vpop.f32.mrf.mxu1  ;;  %v1614_v43 = vadd.f32 %v3470_v55, %v1524_v17 }
 0x2ad   : > { %v2077_v6 = vmul.f32 -1.442695, %v3457_v13  ;;  %v1560_v19 = vadd.f32 %v1559_v31, %v1366_v25 }
 0x2ae   : > { %2432 = vrcp.f32 %v1696_v14  ;;  %v3473_v14 = vpop.f32.mrf.mxu0 }
 0x2af   : > { %v2423_v28 = vpop.eup %2422  ;;  %2434 = vpow2.f32 %v2077_v6  ;;  %v3461_v58 = vadd.f32 %v3408_v3, %v1560_v19  ;;  %v3463_v16 = vpop.f32.mrf.mxu1  ;;  %v1528_v6 = vadd.f32 %v3410_v8, %v3384_v30 }
 0x2b0   : > { %v1697_v26 = vadd.f32 1.0, %v2423_v28  ;;  %v1392_v35 = vpop.f32.mrf.mxu0 }
 0x2b1   : > { %v2078_v25 = vmul.f32 -1.442695, %v3461_v58  ;;  %v1565_v42 = vpop.f32.mrf.mxu1  ;;  %v1616_v8 = vadd.f32 %v3470_v55, %v1528_v6 }
 0x2b2   : > { %2436 = vrcp.f32 %v1697_v26  ;;  %v1566_v34 = vadd.f32 %v1565_v42, %v1372_v9 }
 0x2b3   : > { %v2425_v31 = vpop.eup %2424  ;;  %2438 = vpow2.f32 %v2078_v25  ;;  %v3477_v19 = vpop.f32.mrf.mxu1  ;;  %v1534_v25 = vadd.f32 %v3418_v21, %v3386_v40 }
 0x2b4   : > { %v2427_v27 = vpop.eup %2426  ;;  %v1742_v50 = vmul.f32 %v2425_v31, %v3413_v4  ;;  %v3482_v1 = vadd.f32 %v3408_v3, %v1566_v34 }
 0x2b5   : > { %v1698_v37 = vadd.f32 1.0, %v2427_v27  ;;  %v1569_v28 = vpop.f32.mrf.mxu1 }
 0x2b6   : > { %v1758_v9 = vmul.f32 %v1742_v50, %v1614_v43  ;;  %v2079_v26 = vmul.f32 -1.442695, %v3482_v1  ;;  %v1570_v42 = vadd.f32 %v1569_v28, %v1376_v47  ;;  %v3500_v50 = vpop.f32.mrf.mxu0 }
 0x2b7   : > { %v2429_v30 = vpop.eup %2428  ;;  %2440 = vrcp.f32 %v1698_v37  ;;  %v3488_v17 = vpop.f32.mrf.mxu1  ;;  %v1538_v37 = vadd.f32 %v3424_v23, %v3388_v59 }
 0x2b8   : > { %v2431_v4 = vpop.eup %2430  ;;  %v1774_v34 = vadd.f32 %v1758_v9, %v3205_v38  ;;  %v1743_v31 = vmul.f32 %v2429_v30, %v3421_v53  ;;  %2442 = vpow2.f32 %v2079_v26  ;;  %v3493_v27 = vadd.f32 %v3408_v3, %v1570_v42  ;;  %v1396_v23 = vpop.f32.mrf.mxu0 }
 0x2b9   : > { %v1699_v47 = vadd.f32 1.0, %v2431_v4  ;;  %v1575_v43 = vpop.f32.mrf.mxu1  ;;  %v1618_v53 = vadd.f32 %v3470_v55, %v1534_v25 }
 0x2ba   : > { %1790 = vst [vmem:[%s3496_s6] sm:$0xff] %v1774_v34  ;;  %v1759_v6 = vmul.f32 %v1743_v31, %v1616_v8  ;;  %v2080_v40 = vmul.f32 -1.442695, %v3493_v27  ;;  %v1576_v21 = vadd.f32 %v1575_v43, %v1382_v11  ;;  %v1620_v31 = vadd.f32 %v3470_v55, %v1538_v37 }
 0x2bb   : > { %v2433_v38 = vpop.eup %2432  ;;  %2444 = vrcp.f32 %v1699_v47  ;;  %v3505_v28 = vpop.f32.mrf.mxu1 }
 0x2bc   : > { %v2435_v9 = vpop.eup %2434  ;;  %v1775_v26 = vadd.f32 %v1759_v6, %v3220_v2  ;;  %v1744_v42 = vmul.f32 %v2433_v38, %v3427_v52  ;;  %2446 = vpow2.f32 %v2080_v40  ;;  %v3510_v30 = vadd.f32 %v3408_v3, %v1576_v21 }
 0x2bd   : > { %v1700_v11 = vadd.f32 1.0, %v2435_v9  ;;  %v1579_v8 = vpop.f32.mrf.mxu1  ;;  %v1544_v40 = vadd.f32 %v3435_v33, %v3390_v0 }
 0x2be   : > { %1791 = vst [vmem:[%s3496_s6 + $0x8] sm:$0xff] %v1775_v26  ;;  %v1760_v25 = vmul.f32 %v1744_v42, %v1618_v53  ;;  %v2081_v4 = vmul.f32 -1.442695, %v3510_v30  ;;  %v1580_v59 = vadd.f32 %v1579_v8, %v1386_v7  ;;  %v3526_v53 = vpop.f32.mrf.mxu0  ;;  %v1548_v26 = vadd.f32 %v3438_v15, %v3392_v63 }
 0x2bf   : > { %v2437_v34 = vpop.eup %2436  ;;  %2448 = vrcp.f32 %v1700_v11  ;;  %v1622_v33 = vadd.f32 %v3470_v55, %v1544_v40 }
 0x2c0   : > { %v2439_v2 = vpop.eup %2438  ;;  %v1776_v52 = vadd.f32 %v1760_v25, %v3235_v12  ;;  %v1745_v47 = vmul.f32 %v2437_v34, %v3433_v32  ;;  %2450 = vpow2.f32 %v2081_v4  ;;  %v3518_v43 = vadd.f32 %v3408_v3, %v1580_v59  ;;  %v3520_v6 = vpop.f32.mrf.mxu1 }
 0x2c1   : > { %v1701_v7 = vadd.f32 1.0, %v2439_v2  ;;  %v1624_v34 = vadd.f32 %v3470_v55, %v1548_v26 }
 0x2c2   : > { %1792 = vst [vmem:[%s3496_s6 + $0x10] sm:$0xff] %v1776_v52  ;;  %v1761_v21 = vmul.f32 %v1745_v47, %v1620_v31  ;;  %v2082_v38 = vmul.f32 -1.442695, %v3518_v43  ;;  %v1585_v12 = vpop.f32.mrf.mxu1  ;;  %v1554_v31 = vadd.f32 %v3446_v24, %v3394_v57 }
 0x2c3   : > { %2452 = vrcp.f32 %v1701_v7  ;;  %v1586_v32 = vadd.f32 %v1585_v12, %v1392_v35  ;;  %v1402_v35 = vpop.f32.mrf.mxu0 }
 0x2c4   : > { %v2441_v37 = vpop.eup %2440  ;;  %v1777_v9 = vadd.f32 %v1761_v21, %v3250_v48  ;;  %2454 = vpow2.f32 %v2082_v38  ;;  %v3531_v42 = vpop.f32.mrf.mxu1 }
 0x2c5   : > { %v2443_v0 = vpop.eup %2442  ;;  %v1746_v11 = vmul.f32 %v2441_v37, %v3443_v41  ;;  %v3536_v8 = vadd.f32 %v3408_v3, %v1586_v32  ;;  %v1626_v32 = vadd.f32 %v3470_v55, %v1554_v31 }
 0x2c6   : > { %1793 = vst [vmem:[%s3496_s6 + $0x18] sm:$0xff] %v1777_v9  ;;  %v1702_v25 = vadd.f32 1.0, %v2443_v0  ;;  %v1589_v4 = vpop.f32.mrf.mxu1 }
 0x2c7   : > { %v1762_v59 = vmul.f32 %v1746_v11, %v1622_v33  ;;  %v2083_v48 = vmul.f32 -1.442695, %v3536_v8  ;;  %v1590_v63 = vadd.f32 %v1589_v4, %v1396_v23  ;;  %v3550_v23 = vpop.f32.mrf.mxu0 }
 0x2c8   : > { %v2445_v15 = vpop.eup %2444  ;;  %2456 = vrcp.f32 %v1702_v25  ;;  %v3543_v41 = vpop.f32.mrf.mxu1 }
 0x2c9   : > { %v2447_v2 = vpop.eup %2446  ;;  %v1778_v52 = vadd.f32 %v1762_v59, %v3265_v22  ;;  %v1747_v47 = vmul.f32 %v2445_v15, %v3449_v62  ;;  %2458 = vpow2.f32 %v2083_v48  ;;  %v3548_v40 = vadd.f32 %v3408_v3, %v1590_v63  ;;  %v1406_v11 = vpop.f32.mrf.mxu0 }
 0x2ca   : > { %v1703_v7 = vadd.f32 1.0, %v2447_v2  ;;  %v1595_v21 = vpop.f32.mrf.mxu1  ;;  %v1558_v22 = vadd.f32 %v3452_v44, %v3396_v20  ;;  %v1564_v15 = vadd.f32 %v3463_v16, %v3415_v5 }
 0x2cb   : > { %1794 = vst [vmem:[%s3496_s6 + $0x20] sm:$0xff] %v1778_v52  ;;  %v1763_v38 = vmul.f32 %v1747_v47, %v1624_v34  ;;  %v2084_v57 = vmul.f32 -1.442695, %v3548_v40  ;;  %v1596_v24 = vadd.f32 %v1595_v21, %v1402_v35 }
 0x2cc   : > { %v2449_v12 = vpop.eup %2448  ;;  %2460 = vrcp.f32 %v1703_v7  ;;  %v3557_v62 = vpop.f32.mrf.mxu1  ;;  %v1628_v59 = vadd.f32 %v3470_v55, %v1558_v22  ;;  %v1568_v7 = vadd.f32 %v3477_v19, %v3429_v45 }
 0x2cd   : > { %v2451_v37 = vpop.eup %2450  ;;  %v1779_v9 = vadd.f32 %v1763_v38, %v3283_v51  ;;  %v1748_v26 = vmul.f32 %v2449_v12, %v3457_v13  ;;  %2462 = vpow2.f32 %v2084_v57  ;;  %v3562_v0 = vadd.f32 %v3408_v3, %v1596_v24 }
 0x2ce   : > { %v1704_v33 = vadd.f32 1.0, %v2451_v37  ;;  %v1599_v25 = vpop.f32.mrf.mxu1  ;;  %v1574_v12 = vadd.f32 %v3488_v17, %v3440_v29 }
 0x2cf   : > { %1795 = vst [vmem:[%s3496_s6 + $0x28] sm:$0xff] %v1779_v9  ;;  %v1764_v35 = vmul.f32 %v1748_v26, %v1626_v32  ;;  %v2085_v20 = vmul.f32 -1.442695, %v3562_v0  ;;  %v1600_v44 = vadd.f32 %v1599_v25, %v1406_v11  ;;  %v1578_v9 = vadd.f32 %v3505_v28, %v3454_v60 }
 0x2d0   : > { %v2453_v4 = vpop.eup %2452  ;;  %2464 = vrcp.f32 %v1704_v33  ;;  %v1634_v37 = vadd.f32 %v3470_v55, %v1574_v12  ;;  %v1584_v25 = vadd.f32 %v3520_v6, %v3473_v14 }
 0x2d1   : > { %v2455_v51 = vpop.eup %2454  ;;  %v1780_v13 = vadd.f32 %v1764_v35, %v3291_v49  ;;  %v1749_v48 = vmul.f32 %v2453_v4, %v3461_v58  ;;  %2466 = vpow2.f32 %v2085_v20  ;;  %v3570_v63 = vadd.f32 %v3408_v3, %v1600_v44 }
 0x2d2   : > { %v1705_v34 = vadd.f32 1.0, %v2455_v51  ;;  %v1630_v58 = vadd.f32 %v3470_v55, %v1564_v15  ;;  %v1636_v11 = vadd.f32 %v3470_v55, %v1578_v9  ;;  %v1638_v20 = vadd.f32 %v3470_v55, %v1584_v25 }
 0x2d3   : > { %1796 = vst [vmem:[%s3496_s6 + $0x30] sm:$0xff] %v1780_v13  ;;  %v1765_v31 = vmul.f32 %v1749_v48, %v1628_v59  ;;  %v2086_v2 = vmul.f32 -1.442695, %v3570_v63  ;;  %v1598_v13 = vadd.f32 %v3557_v62, %v3550_v23  ;;  %v3716_v23 = vld [vmem:[#allocation20_spill] sm:$0xff] }
 0x2d4   : > { %2468 = vrcp.f32 %v1705_v34 }
 0x2d5   : > { %v2457_v52 = vpop.eup %2456  ;;  %v1781_v47 = vadd.f32 %v1765_v31, %v3302_v61  ;;  %2470 = vpow2.f32 %v2086_v2  ;;  %v1632_v61 = vadd.f32 %v3470_v55, %v1568_v7 }
 0x2d6   : > { %v2459_v49 = vpop.eup %2458  ;;  %v1750_v3 = vmul.f32 %v2457_v52, %v3482_v1 }
 0x2d7   : > { %1797 = vst [vmem:[%s3496_s6 + $0x38] sm:$0xff] %v1781_v47  ;;  %v1706_v5 = vadd.f32 1.0, %v2459_v49 }
 0x2d8   : > { %v1766_v16 = vmul.f32 %v1750_v3, %v1630_v58 }
 0x2d9   : > { %v2461_v21 = vpop.eup %2460  ;;  %2472 = vrcp.f32 %v1706_v5 }
 0x2da   : > { %v2463_v38 = vpop.eup %2462  ;;  %v1782_v57 = vadd.f32 %v1766_v16, %v3309_v36  ;;  %v1751_v24 = vmul.f32 %v2461_v21, %v3493_v27 }
 0x2db   : > { %v1707_v1 = vadd.f32 1.0, %v2463_v38 }
 0x2dc   : > { %1798 = vst [vmem:[%s3496_s6 + $0x40] sm:$0xff] %v1782_v57  ;;  %v1767_v32 = vmul.f32 %v1751_v24, %v1632_v61 }
 0x2dd   : > { %v2465_v45 = vpop.eup %2464  ;;  %2474 = vrcp.f32 %v1707_v1 }
 0x2de   : > { %v2467_v19 = vpop.eup %2466  ;;  %v1783_v22 = vadd.f32 %v1767_v32, %v3318_v46  ;;  %v1752_v36 = vmul.f32 %v2465_v45, %v3510_v30 }
 0x2df   : > { %v1708_v27 = vadd.f32 1.0, %v2467_v19 }
 0x2e0   : > { %1799 = vst [vmem:[%s3496_s6 + $0x48] sm:$0xff] %v1783_v22  ;;  %v1768_v26 = vmul.f32 %v1752_v36, %v1634_v37 }
 0x2e1   : > { %v2469_v29 = vpop.eup %2468  ;;  %2476 = vrcp.f32 %v1708_v27 }
 0x2e2   : > { %v2471_v17 = vpop.eup %2470  ;;  %v1784_v33 = vadd.f32 %v1768_v26, %v3325_v39  ;;  %v1753_v46 = vmul.f32 %v2469_v29, %v3518_v43  ;;  %v1588_v39 = vadd.f32 %v3531_v42, %v3500_v50 }
 0x2e3   : > { %v1709_v30 = vadd.f32 1.0, %v2471_v17 }
 0x2e4   : > { %1800 = vst [vmem:[%s3496_s6 + $0x50] sm:$0xff] %v1784_v33  ;;  %v1769_v60 = vmul.f32 %v1753_v46, %v1636_v11  ;;  %v1640_v6 = vadd.f32 %v3470_v55, %v1588_v39 }
 0x2e5   : > { %2478 = vrcp.f32 %v1709_v30 }
 0x2e6   : > { %v2473_v28 = vpop.eup %2472  ;;  %v1785_v35 = vadd.f32 %v1769_v60, %v3333_v18  ;;  %v1594_v18 = vadd.f32 %v3543_v41, %v3526_v53  ;;  %v1644_v41 = vadd.f32 %v3470_v55, %v1598_v13 }
 0x2e7   : > { %v1754_v44 = vmul.f32 %v2473_v28, %v3536_v8 }
 0x2e8   : > { %1801 = vst [vmem:[%s3496_s6 + $0x58] sm:$0xff] %v1785_v35  ;;  %v1642_v42 = vadd.f32 %v3470_v55, %v1594_v18 }
 0x2e9   : > { %v1770_v43 = vmul.f32 %v1754_v44, %v1638_v20 }
 0x2ea   : > { %v2475_v4 = vpop.eup %2474 }
 0x2eb   : > { %v1786_v14 = vadd.f32 %v1770_v43, %v3342_v10  ;;  %v1755_v59 = vmul.f32 %v2475_v4, %v3548_v40 }
 0x2ed   : > { %1802 = vst [vmem:[%s3496_s6 + $0x60] sm:$0xff] %v1786_v14  ;;  %v1771_v8 = vmul.f32 %v1755_v59, %v1640_v6 }
 0x2ee   : > { %v2477_v51 = vpop.eup %2476 }
 0x2ef   : > { %v1787_v50 = vadd.f32 %v1771_v8, %v3350_v54  ;;  %v1756_v10 = vmul.f32 %v2477_v51, %v3562_v0 }
 0x2f1   : > { %1803 = vst [vmem:[%s3496_s6 + $0x68] sm:$0xff] %v1787_v50  ;;  %v1772_v40 = vmul.f32 %v1756_v10, %v1642_v42 }
 0x2f2   : > { %v2479_v48 = vpop.eup %2478 }
 0x2f3   : > { %v1788_v53 = vadd.f32 %v1772_v40, %v3359_v56  ;;  %v1757_v15 = vmul.f32 %v2479_v48, %v3570_v63 }
 0x2f5   : > { %1804 = vst [vmem:[%s3496_s6 + $0x70] sm:$0xff] %v1788_v53  ;;  %v1773_v54 = vmul.f32 %v1757_v15, %v1644_v41 }
 0x2f7   : > { %v1789_v56 = vadd.f32 %v1773_v54, %v3716_v23 }
 0x2f9   : > { %1805 = vst [vmem:[%s3496_s6 + $0x78] sm:$0xff] %v1789_v56 }
 0x2fa   : > { %2653 = shalt.err (!%p2650_p0)
}
 0x2fb   : > { %s2654_s2 = scalar_lea.hbm %s3627_s10, 2048  ;;  %s2658_s11 = scalar_lea.hbm %s3681_s8, 8192 }
 0x2fc   : > { %p2655_p8 = scmp.ne.s32.totalorder %s3627_s10, %s2654_s2  ;;  %p2659_p7 = scmp.lt.s32.totalorder %s3627_s10, %s3681_s8 }
 0x2fd   : > { %p2660_p1 = scmp.lt.s32.totalorder %s2658_s11, %s2654_s2 }
 0x2fe   : > { %p2656_p2 = pnand %p2655_p8, %p3717_p10 }
 0x2ff   : > { %p2661_p12 = por %p2660_p1, %p2659_p7 }
 0x300   : > { %p2657_p9 = pneg %p2656_p2 }
 0x302   : > { %p2662_p13 = pnand %p2661_p12, %p2657_p9 }
 0x304   : > { %2665 = shalt.err (!%p2662_p13)
}
 0x305   : > { %s2732_s16 = smov 128   ;;  %s2733_s6 = smov 8  }
 0x306   : > { %2115 = dma.vmem_to_hbm [thread:$0]  (%p3717_p10), %s3629_s21, 2048, %s3627_s10, %s1807_s23, %s2732_s16, %s2732_s16, %s2733_s6  }
 0x307 PF: > { %p2150_p3 = scmp.ge.s32.totalorder %s2720_s30, 2  ;;  %s1835_s19 = sand.u32 1, %s2708_s27  }
 0x308   : > { %p3718_p11 = scmp.ne.s32.totalorder %s3696_s12, 0  ;;  %s1836_s3 = scalar_lea.sflag [#allocation4], %s1835_s19 }
 0x30a   : > { %p2138_p4 = pnand %p2150_p3, %p3718_p11 }
 0x30c   : > { %p2139_p6 = pneg %p2138_p4 }
 0x30e   : > { %2703 = dma.done.wait (%p2139_p6), %s1836_s3, 2048  }
 0x30f   : > { %2705 = vsyncadd (%p2139_p6), %s1836_s3, 4294965248  ;;  %p26_p5 = scmp.ge.s32.totalorder %s2878_s26, 6   ;;  %s3719_s27 = smov %s2712_s28 }
 0x310   : > { %s3720_s28 = smov %s2716_s29  ;;  %s3721_s29 = smov %s2894_s15 }
 0x311   : > { %s3722_s30 = smov %s2878_s26  ;;  %28 = sbr.rel (!%p26_p5) target bundleno = 15 (0xf), region = 126 }
 0x316   :  { %1841 = vsyncpa [#allocation3], 1 }
 0x317   :  { %1843 = vsyncpa [#allocation3 + $0x1], 1 }
 0x318   :  { %1844 = vsyncpa [#allocation6], 1 }
 0x319   :  { %1846 = vsyncpa [#allocation6 + $0x1], 1 }
 0x31a   :  { %1847 = vsyncpa [#allocation9], 1 }
 0x31b   :  { %1848 = vsyncpa [#allocation12], 1 }
 0x31c   :  { %1849 = vsyncpa [#allocation4], 1 }
 0x31d   :  { %1851 = vsyncpa [#allocation4 + $0x1], 1 }

</bundles_post_ra>
